<compile_context>
chip_gen: v6e
topology: v6e:2x2x1
jax: 0.10.0
libtpu: 0.0.40
codegen_flags: <defaults>
</compile_context>

<pallas_src>
import math

import jax
import jax.numpy as jnp
from jax import lax
from jax.experimental import pallas as pl
from jax.experimental.pallas import tpu as pltpu  # noqa: F401  (TPU backend)

# ---- static config (small shapes consistent with the module) ----
B = 2            # batch
S = 8            # input sequence length (num characters)
L = 32           # signal_length
M = 8            # m_tokens
V = 16           # token_vocab_size
D = 32           # token_embedding_dim
H = 4            # attention heads (fixed to 4 in the module)
HD = D // H      # head dim
BM = B * M       # batch folded into rows for the token pipeline


# ------------------------------------------------------------------ param-slab row map
def _alloc_rows():
    entries = [("tshift", B * S), ("sel_rep", BM), ("w_lin_t", L), ("b_lin", 1),
               ("fold_mask", BM), ("fold_g", M * V), ("emb", V),
               ("head_mask", H * BM), ("attn_mask", H * BM)]
    for i in (1, 2):
        entries += [(f"wqkv{i}", D), (f"bqkv{i}", 1), (f"wo{i}", D),
                    (f"bo{i}", 1), (f"gamma{i}", 1), (f"beta{i}", 1)]
    rows, cur = {}, 0
    for name, n in entries:
        rows[name] = cur
        cur += n
    return rows, ((cur + 7) // 8) * 8


_ROW, R_TOTAL = _alloc_rows()

# packed output slab lane layout (16 rows x 128 lanes)
O_TE1 = 0            # lanes [0:32)   token_embeds (post attn1+LN)
O_TE2 = D            # lanes [32:64)  refined (post attn2+LN)
O_LG = 2 * D         # lanes [64:80)  logits (BM, V) row layout
O_NORM = 2 * D + V   # lanes [80:112) normalized signal, rows 0:2
O_WIDTH = 128


# ------------------------------------------------------------------ fused kernel
def _fused_kernel(freqs_ref, w_ref, out_ref):
    f32 = jnp.float32

    def W(name, nrows, ncols):
        r = _ROW[name]
        return w_ref[r:r + nrows, 0:ncols]          # static slice: zero-cost view load

    # ---------------- 1) signal encoding ----------------
    # rows of `sig` are b*S + i; sin(roll(t, i)) == roll(sin(t), i).
    sig = jnp.sin((2.0 * math.pi) * freqs_ref[...] * W("tshift", B * S, L))   # (16,32)
    # per-batch sum via ONE MXU matmul with a baked 0/1 selection matrix,
    # replicated to rows b*M+m so the whole pipeline stays in (BM, ...) layout.
    ctx = jnp.dot(W("sel_rep", BM, B * S), sig, preferred_element_type=f32)   # (16,32)
    # exact L2 normalisation with the module's eps placement: x / (||x|| + 1e-8)
    nrm = jnp.sqrt(jnp.sum(ctx * ctx, axis=-1, keepdims=True)) + 1e-8
    normalized = ctx / nrm                                                    # (16,32)

    # ---------------- 2) linear -> logits directly in (BM, V) row layout ----------------
    logits_rep = (jnp.dot(normalized, W("w_lin_t", L, M * V),
                          preferred_element_type=f32) + W("b_lin", 1, M * V))  # (16,128)
    # fold the 128 lanes (m-major) into (BM, V) with a baked mask + matmul (no relayouts)
    lg = jnp.dot(logits_rep * W("fold_mask", BM, M * V), W("fold_g", M * V, V),
                 preferred_element_type=f32)                                   # (16,16)

    # ---------------- 3) tokenization: softmax + probs @ embedding ----------------
    mx = jnp.max(lg, axis=-1, keepdims=True)
    e = jnp.exp(lg - mx)
    probs = e * pl.reciprocal(jnp.sum(e, axis=-1, keepdims=True), approx=True)
    te0 = jnp.dot(probs, W("emb", V, D), preferred_element_type=f32)           # (16,32)

    # ---------------- 4) merged-head attention + LayerNorm (x2) ----------------
    head_mask = W("head_mask", H * BM, D)        # (64,32) 0/1: keep lanes of own head
    attn_mask = W("attn_mask", H * BM, H * BM)   # (64,64) additive, block-diag (head,batch)

    def attn_ln(x, i):
        wqkv = W(f"wqkv{i}", D, 3 * D)           # Q columns pre-scaled by 1/sqrt(HD)
        bqkv = W(f"bqkv{i}", 1, 3 * D)
        wo_t = W(f"wo{i}", D, D)
        bo = W(f"bo{i}", 1, D)
        gamma = W(f"gamma{i}", 1, D)
        beta = W(f"beta{i}", 1, D)

        qkv = jnp.dot(x, wqkv, preferred_element_type=f32) + bqkv              # (16,96)
        # stack heads on sublanes: row h*BM + (b*M + m)
        qkv_rep = jnp.concatenate([qkv, qkv, qkv, qkv], axis=0)                # (64,96)
        q_rep = qkv_rep[:, 0:D]                                                # (64,32)
        k_blk = qkv_rep[:, D:2 * D] * head_mask                                # (64,32)
        v_blk = qkv_rep[:, 2 * D:3 * D] * head_mask                            # (64,32)
        # all-head scores in ONE push; wrong (head,batch) pairs masked additively
        s = lax.dot_general(q_rep, k_blk, (((1,), (1,)), ((), ())),
                            preferred_element_type=f32) + attn_mask            # (64,64)
        smx = jnp.max(s, axis=-1, keepdims=True)
        es = jnp.exp(s - smx)
        p = es * pl.reciprocal(jnp.sum(es, axis=-1, keepdims=True), approx=True)
        # head-h output lands in its own lane block (masked lanes are exactly 0)
        o_exp = jnp.dot(p, v_blk, preferred_element_type=f32)                  # (64,32)
        ow = jnp.dot(o_exp, wo_t, preferred_element_type=f32)                  # (64,32)
        # sum the 4 head row-blocks == concat(heads) @ Wo^T, without any concat
        attn = ow[0:BM] + ow[BM:2 * BM] + ow[2 * BM:3 * BM] + ow[3 * BM:4 * BM] + bo
        # dropout layers are identity in eval/inference mode (no RNG applied)
        y = x + attn
        mu = jnp.mean(y, axis=-1, keepdims=True)
        var = jnp.mean((y - mu) ** 2, axis=-1, keepdims=True)
        return (y - mu) * lax.rsqrt(var + 1e-5) * gamma + beta

    te1 = attn_ln(te0, 1)   # token_embeds (module reassigns -> post attn1+LN value)
    te2 = attn_ln(te1, 2)   # refined

    # ---------------- 5) single lane-dense (16,128) packed output slab ----------------
    out_ref[...] = jnp.zeros((BM, O_WIDTH), f32)
    out_ref[:, O_TE1:O_TE1 + D] = te1
    out_ref[:, O_TE2:O_TE2 + D] = te2
    out_ref[:, O_LG:O_LG + V] = lg
    out_ref[0:1, O_NORM:O_NORM + L] = normalized[0:1, :]     # batch 0 (row 0)
    out_ref[1:2, O_NORM:O_NORM + L] = normalized[M:M + 1, :]  # batch 1 (row M)


# ------------------------------------------------------------- full forward (glue + kernel)
def pattern_encoder_forward(input_indices, prime_tensor, params):
    # thin XLA glue: only the data-dependent prime-frequency gather stays outside
    freqs_col = prime_tensor[input_indices].astype(jnp.float32).reshape(B * S, 1)

    slab_out = pl.pallas_call(
        _fused_kernel,
        out_shape=jax.ShapeDtypeStruct((BM, O_WIDTH), jnp.float32),
    )(freqs_col, params["slab"])

    token_embeds = slab_out[:, O_TE1:O_TE1 + D].reshape(B, M, D)
    token_flat = slab_out[:, O_TE2:O_TE2 + D].reshape(B, M * D)
    logits = slab_out[:, O_LG:O_LG + V].reshape(B, M, V)
    normalized_signal = slab_out[0:B, O_NORM:O_NORM + L]
    return token_flat, logits, token_embeds, normalized_signal


# ------------------------------------------------------------- deterministic param init
def init_params(key):
    ks = jax.random.split(key, 5)

    def nrm(k, shape, scale):
        return scale * jax.random.normal(k, shape, dtype=jnp.float32)

    # nn.Linear(signal_length, m_tokens * token_vocab_size): weight [out, in]
    w_lin = nrm(ks[0], (M * V, L), 1.0 / math.sqrt(L))
    b_lin = nrm(ks[1], (M * V,), 0.01)
    emb = nrm(ks[2], (V, D), 1.0)                              # nn.Embedding weight

    scale = 1.0 / math.sqrt(HD)

    def mha_params(k):
        kk = jax.random.split(k, 4)
        in_w = nrm(kk[0], (3 * D, D), 1.0 / math.sqrt(D))      # in_proj_weight [3D, D]
        in_b = nrm(kk[1], (3 * D,), 0.01)
        out_w = nrm(kk[2], (D, D), 1.0 / math.sqrt(D))         # out_proj.weight [D, D]
        out_b = nrm(kk[3], (D,), 0.01)
        wqkv = in_w.T                                          # (D, 3D): y = x @ in_w.T
        wqkv = wqkv.at[:, :D].multiply(scale)                  # fold 1/sqrt(HD) into Q
        bqkv = in_b.at[:D].multiply(scale)
        return dict(wqkv=wqkv, bqkv=bqkv, wo=out_w.T, bo=out_b,
                    gamma=jnp.ones((D,), jnp.float32),
                    beta=jnp.zeros((D,), jnp.float32))

    a1 = mha_params(ks[3])
    a2 = mha_params(ks[4])

    # ---- static constants baked into the slab ----
    t = jnp.linspace(0.0, 1.0, L, dtype=jnp.float32)           # time_vector
    tshift = jnp.stack([jnp.roll(t, i) for i in range(S)], axis=0)          # (S, L)
    tshift_rep = jnp.tile(tshift, (B, 1))                                    # (B*S, L)

    rbm = jnp.arange(BM)
    r64 = jnp.arange(H * BM)
    sel_rep = (rbm[:, None] // M == jnp.arange(B * S)[None, :] // S
               ).astype(jnp.float32)                                         # (16,16)
    fold_mask = ((jnp.arange(M * V)[None, :] // V) == (rbm % M)[:, None]
                 ).astype(jnp.float32)                                       # (16,128)
    fold_g = ((jnp.arange(M * V)[:, None] % V) == jnp.arange(V)[None, :]
              ).astype(jnp.float32)                                          # (128,16)
    head_mask = ((r64 // BM)[:, None] == (jnp.arange(D) // HD)[None, :]
                 ).astype(jnp.float32)                                       # (64,32)
    attn_mask = jnp.where((r64[:, None] // M) == (r64[None, :] // M),
                          0.0, -1e30).astype(jnp.float32)                    # (64,64)

    slab = jnp.zeros((R_TOTAL, 128), jnp.float32)

    def put(s, name, piece):
        piece = jnp.asarray(piece, jnp.float32)
        if piece.ndim == 1:
            piece = piece[None, :]
        r = _ROW[name]
        h, w = piece.shape
        return s.at[r:r + h, 0:w].set(piece)

    slab = put(slab, "tshift", tshift_rep)
    slab = put(slab, "sel_rep", sel_rep)
    slab = put(slab, "w_lin_t", w_lin.T)          # (L, M*V) so kernel does x @ W^T
    slab = put(slab, "b_lin", b_lin)
    slab = put(slab, "fold_mask", fold_mask)
    slab = put(slab, "fold_g", fold_g)
    slab = put(slab, "emb", emb)
    slab = put(slab, "head_mask", head_mask)
    slab = put(slab, "attn_mask", attn_mask)
    for i, a in ((1, a1), (2, a2)):
        slab = put(slab, f"wqkv{i}", a["wqkv"])
        slab = put(slab, f"bqkv{i}", a["bqkv"])
        slab = put(slab, f"wo{i}", a["wo"])
        slab = put(slab, f"bo{i}", a["bo"])
        slab = put(slab, f"gamma{i}", a["gamma"])
        slab = put(slab, f"beta{i}", a["beta"])

    return {"slab": slab}


if __name__ == "__main__":
    key = jax.random.PRNGKey(0)
    pkey, ikey = jax.random.split(key)
    params = init_params(pkey)

    prime_tensor = jnp.array(
        [2, 3, 5, 7, 11, 13, 17, 19, 23, 29, 31, 37, 41, 43, 47, 53],
        dtype=jnp.float32)
    input_indices = jax.random.randint(ikey, (B, S), 0, prime_tensor.shape[0],
                                       dtype=jnp.int32)

    outs = pattern_encoder_forward(input_indices, prime_tensor, params)
    outs = jax.block_until_ready(outs)
    token_flat, logits, token_embeds, normalized_signal = outs

    assert token_flat.shape == (B, M * D)
    assert logits.shape == (B, M, V)
    assert token_embeds.shape == (B, M, D)
    assert normalized_signal.shape == (B, L)
    assert bool(jnp.all(jnp.isfinite(token_flat)))
    assert bool(jnp.all(jnp.isfinite(logits)))
    assert bool(jnp.all(jnp.isfinite(token_embeds)))
    assert bool(jnp.all(jnp.isfinite(normalized_signal)))
    print("KERNEL_OK")
</pallas_src>

<mosaic_0001>
module attributes {stable_mosaic.version = 11 : i64} {
  func.func @_fused_kernel(%arg0: memref<16x1xf32, #tpu.memory_space<vmem>>, %arg1: memref<496x128xf32, #tpu.memory_space<vmem>>, %arg2: memref<16x128xf32, #tpu.memory_space<vmem>>) attributes {dimension_semantics = [], scalar_prefetch = 0 : i64, scratch_operands = 0 : i64, tpu.core_type = #tpu.core_type<tc>} {
    %c0 = arith.constant 0 : index
    %c0_0 = arith.constant 0 : index
    %0 = vector.load %arg0[%c0, %c0_0] : memref<16x1xf32, #tpu.memory_space<vmem>>, vector<16x1xf32>
    %cst = arith.constant 6.28318548 : f32
    %1 = vector.broadcast %cst : f32 to vector<16x1xf32>
    %2 = arith.mulf %1, %0 : vector<16x1xf32>
    %c0_1 = arith.constant 0 : index
    %c0_2 = arith.constant 0 : index
    %3 = vector.load %arg1[%c0_1, %c0_2] : memref<496x128xf32, #tpu.memory_space<vmem>>, vector<16x32xf32>
    %4 = vector.broadcast %2 : vector<16x1xf32> to vector<16x32xf32>
    %5 = arith.mulf %4, %3 : vector<16x32xf32>
    %6 = math.sin %5 : vector<16x32xf32>
    %c16 = arith.constant 16 : index
    %c0_3 = arith.constant 0 : index
    %7 = vector.load %arg1[%c16, %c0_3] : memref<496x128xf32, #tpu.memory_space<vmem>>, vector<16x16xf32>
    %cst_4 = arith.constant dense<0.000000e+00> : vector<16x32xf32>
    %8 = tpu.matmul %7, %6, %cst_4 {dimension_numbers = #tpu.dot_dimension_numbers<[1], [0], [0], [1], [0, 0, 1, 1], [], []>} : vector<16x16xf32>, vector<16x32xf32>, vector<16x32xf32> -> vector<16x32xf32>
    %9 = arith.mulf %8, %8 : vector<16x32xf32>
    %cst_5 = arith.constant dense<0.000000e+00> : vector<16xf32>
    %10 = vector.multi_reduction <add>, %9, %cst_5 [1] : vector<16x32xf32> to vector<16xf32>
    %11 = vector.shape_cast %10 : vector<16xf32> to vector<16x1xf32>
    %12 = math.sqrt %11 : vector<16x1xf32>
    %cst_6 = arith.constant 9.99999993E-9 : f32
    %13 = vector.broadcast %cst_6 : f32 to vector<16x1xf32>
    %14 = arith.addf %12, %13 : vector<16x1xf32>
    %15 = vector.broadcast %14 : vector<16x1xf32> to vector<16x32xf32>
    %16 = arith.divf %8, %15 : vector<16x32xf32>
    %c32 = arith.constant 32 : index
    %c0_7 = arith.constant 0 : index
    %17 = vector.load %arg1[%c32, %c0_7] : memref<496x128xf32, #tpu.memory_space<vmem>>, vector<32x128xf32>
    %cst_8 = arith.constant dense<0.000000e+00> : vector<16x128xf32>
    %18 = tpu.matmul %16, %17, %cst_8 {dimension_numbers = #tpu.dot_dimension_numbers<[1], [0], [0], [1], [0, 0, 1, 1], [], []>} : vector<16x32xf32>, vector<32x128xf32>, vector<16x128xf32> -> vector<16x128xf32>
    %c64 = arith.constant 64 : index
    %c0_9 = arith.constant 0 : index
    %19 = vector.load %arg1[%c64, %c0_9] : memref<496x128xf32, #tpu.memory_space<vmem>>, vector<1x128xf32>
    %20 = vector.broadcast %19 : vector<1x128xf32> to vector<16x128xf32>
    %21 = arith.addf %18, %20 : vector<16x128xf32>
    %c65 = arith.constant 65 : index
    %c0_10 = arith.constant 0 : index
    %22 = vector.load %arg1[%c65, %c0_10] : memref<496x128xf32, #tpu.memory_space<vmem>>, vector<16x128xf32>
    %23 = arith.mulf %21, %22 : vector<16x128xf32>
    %c81 = arith.constant 81 : index
    %c0_11 = arith.constant 0 : index
    %24 = vector.load %arg1[%c81, %c0_11] : memref<496x128xf32, #tpu.memory_space<vmem>>, vector<128x16xf32>
    %cst_12 = arith.constant dense<0.000000e+00> : vector<16x16xf32>
    %25 = tpu.matmul %23, %24, %cst_12 {dimension_numbers = #tpu.dot_dimension_numbers<[1], [0], [0], [1], [0, 0, 1, 1], [], []>} : vector<16x128xf32>, vector<128x16xf32>, vector<16x16xf32> -> vector<16x16xf32>
    %cst_13 = arith.constant dense<0xFF800000> : vector<16xf32>
    %26 = vector.multi_reduction <maximumf>, %25, %cst_13 [1] : vector<16x16xf32> to vector<16xf32>
    %27 = vector.shape_cast %26 : vector<16xf32> to vector<16x1xf32>
    %28 = vector.broadcast %27 : vector<16x1xf32> to vector<16x16xf32>
    %29 = arith.subf %25, %28 : vector<16x16xf32>
    %30 = math.exp %29 : vector<16x16xf32>
    %cst_14 = arith.constant dense<0.000000e+00> : vector<16xf32>
    %31 = vector.multi_reduction <add>, %30, %cst_14 [1] : vector<16x16xf32> to vector<16xf32>
    %32 = vector.shape_cast %31 : vector<16xf32> to vector<16x1xf32>
    %33 = tpu.reciprocal %32 {approx = true} : vector<16x1xf32> -> vector<16x1xf32>
    %34 = vector.broadcast %33 : vector<16x1xf32> to vector<16x16xf32>
    %35 = arith.mulf %30, %34 : vector<16x16xf32>
    %c209 = arith.constant 209 : index
    %c0_15 = arith.constant 0 : index
    %36 = vector.load %arg1[%c209, %c0_15] : memref<496x128xf32, #tpu.memory_space<vmem>>, vector<16x32xf32>
    %cst_16 = arith.constant dense<0.000000e+00> : vector<16x32xf32>
    %37 = tpu.matmul %35, %36, %cst_16 {dimension_numbers = #tpu.dot_dimension_numbers<[1], [0], [0], [1], [0, 0, 1, 1], [], []>} : vector<16x16xf32>, vector<16x32xf32>, vector<16x32xf32> -> vector<16x32xf32>
    %c225 = arith.constant 225 : index
    %c0_17 = arith.constant 0 : index
    %38 = vector.load %arg1[%c225, %c0_17] : memref<496x128xf32, #tpu.memory_space<vmem>>, vector<64x32xf32>
    %c289 = arith.constant 289 : index
    %c0_18 = arith.constant 0 : index
    %39 = vector.load %arg1[%c289, %c0_18] : memref<496x128xf32, #tpu.memory_space<vmem>>, vector<64x64xf32>
    %c353 = arith.constant 353 : index
    %c0_19 = arith.constant 0 : index
    %40 = vector.load %arg1[%c353, %c0_19] : memref<496x128xf32, #tpu.memory_space<vmem>>, vector<32x96xf32>
    %c385 = arith.constant 385 : index
    %c0_20 = arith.constant 0 : index
    %41 = vector.load %arg1[%c385, %c0_20] : memref<496x128xf32, #tpu.memory_space<vmem>>, vector<1x96xf32>
    %c386 = arith.constant 386 : index
    %c0_21 = arith.constant 0 : index
    %42 = vector.load %arg1[%c386, %c0_21] : memref<496x128xf32, #tpu.memory_space<vmem>>, vector<32x32xf32>
    %c418 = arith.constant 418 : index
    %c0_22 = arith.constant 0 : index
    %43 = vector.load %arg1[%c418, %c0_22] : memref<496x128xf32, #tpu.memory_space<vmem>>, vector<1x32xf32>
    %c419 = arith.constant 419 : index
    %c0_23 = arith.constant 0 : index
    %44 = vector.load %arg1[%c419, %c0_23] : memref<496x128xf32, #tpu.memory_space<vmem>>, vector<1x32xf32>
    %c420 = arith.constant 420 : index
    %c0_24 = arith.constant 0 : index
    %45 = vector.load %arg1[%c420, %c0_24] : memref<496x128xf32, #tpu.memory_space<vmem>>, vector<1x32xf32>
    %cst_25 = arith.constant dense<0.000000e+00> : vector<16x96xf32>
    %46 = tpu.matmul %37, %40, %cst_25 {dimension_numbers = #tpu.dot_dimension_numbers<[1], [0], [0], [1], [0, 0, 1, 1], [], []>} : vector<16x32xf32>, vector<32x96xf32>, vector<16x96xf32> -> vector<16x96xf32>
    %47 = vector.broadcast %41 : vector<1x96xf32> to vector<16x96xf32>
    %48 = arith.addf %46, %47 : vector<16x96xf32>
    %49 = tpu.concatenate %48, %48, %48, %48 in 0 : vector<16x96xf32>, vector<16x96xf32>, vector<16x96xf32>, vector<16x96xf32> -> vector<64x96xf32>
    %50 = vector.extract_strided_slice %49 {offsets = [0, 0], sizes = [64, 32], strides = [1, 1]} : vector<64x96xf32> to vector<64x32xf32>
    %51 = vector.extract_strided_slice %49 {offsets = [0, 32], sizes = [64, 32], strides = [1, 1]} : vector<64x96xf32> to vector<64x32xf32>
    %52 = arith.mulf %51, %38 : vector<64x32xf32>
    %53 = vector.extract_strided_slice %49 {offsets = [0, 64], sizes = [64, 32], strides = [1, 1]} : vector<64x96xf32> to vector<64x32xf32>
    %54 = arith.mulf %53, %38 : vector<64x32xf32>
    %cst_26 = arith.constant dense<0.000000e+00> : vector<64x64xf32>
    %55 = tpu.matmul %50, %52, %cst_26 {dimension_numbers = #tpu.dot_dimension_numbers<[1], [1], [0], [0], [0, 0, 1, 0], [], []>} : vector<64x32xf32>, vector<64x32xf32>, vector<64x64xf32> -> vector<64x64xf32>
    %56 = arith.addf %55, %39 : vector<64x64xf32>
    %cst_27 = arith.constant dense<0xFF800000> : vector<64xf32>
    %57 = vector.multi_reduction <maximumf>, %56, %cst_27 [1] : vector<64x64xf32> to vector<64xf32>
    %58 = vector.shape_cast %57 : vector<64xf32> to vector<64x1xf32>
    %59 = vector.broadcast %58 : vector<64x1xf32> to vector<64x64xf32>
    %60 = arith.subf %56, %59 : vector<64x64xf32>
    %61 = math.exp %60 : vector<64x64xf32>
    %cst_28 = arith.constant dense<0.000000e+00> : vector<64xf32>
    %62 = vector.multi_reduction <add>, %61, %cst_28 [1] : vector<64x64xf32> to vector<64xf32>
    %63 = vector.shape_cast %62 : vector<64xf32> to vector<64x1xf32>
    %64 = tpu.reciprocal %63 {approx = true} : vector<64x1xf32> -> vector<64x1xf32>
    %65 = vector.broadcast %64 : vector<64x1xf32> to vector<64x64xf32>
    %66 = arith.mulf %61, %65 : vector<64x64xf32>
    %cst_29 = arith.constant dense<0.000000e+00> : vector<64x32xf32>
    %67 = tpu.matmul %66, %54, %cst_29 {dimension_numbers = #tpu.dot_dimension_numbers<[1], [0], [0], [1], [0, 0, 1, 1], [], []>} : vector<64x64xf32>, vector<64x32xf32>, vector<64x32xf32> -> vector<64x32xf32>
    %cst_30 = arith.constant dense<0.000000e+00> : vector<64x32xf32>
    %68 = tpu.matmul %67, %42, %cst_30 {dimension_numbers = #tpu.dot_dimension_numbers<[1], [0], [0], [1], [0, 0, 1, 1], [], []>} : vector<64x32xf32>, vector<32x32xf32>, vector<64x32xf32> -> vector<64x32xf32>
    %69 = vector.extract_strided_slice %68 {offsets = [0, 0], sizes = [16, 32], strides = [1, 1]} : vector<64x32xf32> to vector<16x32xf32>
    %70 = vector.extract_strided_slice %68 {offsets = [16, 0], sizes = [16, 32], strides = [1, 1]} : vector<64x32xf32> to vector<16x32xf32>
    %71 = arith.addf %69, %70 : vector<16x32xf32>
    %72 = vector.extract_strided_slice %68 {offsets = [32, 0], sizes = [16, 32], strides = [1, 1]} : vector<64x32xf32> to vector<16x32xf32>
    %73 = arith.addf %71, %72 : vector<16x32xf32>
    %74 = vector.extract_strided_slice %68 {offsets = [48, 0], sizes = [16, 32], strides = [1, 1]} : vector<64x32xf32> to vector<16x32xf32>
    %75 = arith.addf %73, %74 : vector<16x32xf32>
    %76 = vector.broadcast %43 : vector<1x32xf32> to vector<16x32xf32>
    %77 = arith.addf %75, %76 : vector<16x32xf32>
    %78 = arith.addf %37, %77 : vector<16x32xf32>
    %cst_31 = arith.constant dense<0.000000e+00> : vector<16xf32>
    %79 = vector.multi_reduction <add>, %78, %cst_31 [1] : vector<16x32xf32> to vector<16xf32>
    %80 = vector.shape_cast %79 : vector<16xf32> to vector<16x1xf32>
    %cst_32 = arith.constant 3.200000e+01 : f32
    %81 = vector.broadcast %cst_32 : f32 to vector<16x1xf32>
    %82 = arith.divf %80, %81 : vector<16x1xf32>
    %83 = vector.broadcast %82 : vector<16x1xf32> to vector<16x32xf32>
    %84 = arith.subf %78, %83 : vector<16x32xf32>
    %85 = arith.mulf %84, %84 : vector<16x32xf32>
    %cst_33 = arith.constant dense<0.000000e+00> : vector<16xf32>
    %86 = vector.multi_reduction <add>, %85, %cst_33 [1] : vector<16x32xf32> to vector<16xf32>
    %87 = vector.shape_cast %86 : vector<16xf32> to vector<16x1xf32>
    %cst_34 = arith.constant 3.200000e+01 : f32
    %88 = vector.broadcast %cst_34 : f32 to vector<16x1xf32>
    %89 = arith.divf %87, %88 : vector<16x1xf32>
    %90 = vector.broadcast %82 : vector<16x1xf32> to vector<16x32xf32>
    %91 = arith.subf %78, %90 : vector<16x32xf32>
    %cst_35 = arith.constant 9.99999974E-6 : f32
    %92 = vector.broadcast %cst_35 : f32 to vector<16x1xf32>
    %93 = arith.addf %89, %92 : vector<16x1xf32>
    %94 = math.rsqrt %93 : vector<16x1xf32>
    %95 = vector.broadcast %94 : vector<16x1xf32> to vector<16x32xf32>
    %96 = arith.mulf %91, %95 : vector<16x32xf32>
    %97 = vector.broadcast %44 : vector<1x32xf32> to vector<16x32xf32>
    %98 = arith.mulf %96, %97 : vector<16x32xf32>
    %99 = vector.broadcast %45 : vector<1x32xf32> to vector<16x32xf32>
    %100 = arith.addf %98, %99 : vector<16x32xf32>
    %c421 = arith.constant 421 : index
    %c0_36 = arith.constant 0 : index
    %101 = vector.load %arg1[%c421, %c0_36] : memref<496x128xf32, #tpu.memory_space<vmem>>, vector<32x96xf32>
    %c453 = arith.constant 453 : index
    %c0_37 = arith.constant 0 : index
    %102 = vector.load %arg1[%c453, %c0_37] : memref<496x128xf32, #tpu.memory_space<vmem>>, vector<1x96xf32>
    %c454 = arith.constant 454 : index
    %c0_38 = arith.constant 0 : index
    %103 = vector.load %arg1[%c454, %c0_38] : memref<496x128xf32, #tpu.memory_space<vmem>>, vector<32x32xf32>
    %c486 = arith.constant 486 : index
    %c0_39 = arith.constant 0 : index
    %104 = vector.load %arg1[%c486, %c0_39] : memref<496x128xf32, #tpu.memory_space<vmem>>, vector<1x32xf32>
    %c487 = arith.constant 487 : index
    %c0_40 = arith.constant 0 : index
    %105 = vector.load %arg1[%c487, %c0_40] : memref<496x128xf32, #tpu.memory_space<vmem>>, vector<1x32xf32>
    %c488 = arith.constant 488 : index
    %c0_41 = arith.constant 0 : index
    %106 = vector.load %arg1[%c488, %c0_41] : memref<496x128xf32, #tpu.memory_space<vmem>>, vector<1x32xf32>
    %cst_42 = arith.constant dense<0.000000e+00> : vector<16x96xf32>
    %107 = tpu.matmul %100, %101, %cst_42 {dimension_numbers = #tpu.dot_dimension_numbers<[1], [0], [0], [1], [0, 0, 1, 1], [], []>} : vector<16x32xf32>, vector<32x96xf32>, vector<16x96xf32> -> vector<16x96xf32>
    %108 = vector.broadcast %102 : vector<1x96xf32> to vector<16x96xf32>
    %109 = arith.addf %107, %108 : vector<16x96xf32>
    %110 = tpu.concatenate %109, %109, %109, %109 in 0 : vector<16x96xf32>, vector<16x96xf32>, vector<16x96xf32>, vector<16x96xf32> -> vector<64x96xf32>
    %111 = vector.extract_strided_slice %110 {offsets = [0, 0], sizes = [64, 32], strides = [1, 1]} : vector<64x96xf32> to vector<64x32xf32>
    %112 = vector.extract_strided_slice %110 {offsets = [0, 32], sizes = [64, 32], strides = [1, 1]} : vector<64x96xf32> to vector<64x32xf32>
    %113 = arith.mulf %112, %38 : vector<64x32xf32>
    %114 = vector.extract_strided_slice %110 {offsets = [0, 64], sizes = [64, 32], strides = [1, 1]} : vector<64x96xf32> to vector<64x32xf32>
    %115 = arith.mulf %114, %38 : vector<64x32xf32>
    %cst_43 = arith.constant dense<0.000000e+00> : vector<64x64xf32>
    %116 = tpu.matmul %111, %113, %cst_43 {dimension_numbers = #tpu.dot_dimension_numbers<[1], [1], [0], [0], [0, 0, 1, 0], [], []>} : vector<64x32xf32>, vector<64x32xf32>, vector<64x64xf32> -> vector<64x64xf32>
    %117 = arith.addf %116, %39 : vector<64x64xf32>
    %cst_44 = arith.constant dense<0xFF800000> : vector<64xf32>
    %118 = vector.multi_reduction <maximumf>, %117, %cst_44 [1] : vector<64x64xf32> to vector<64xf32>
    %119 = vector.shape_cast %118 : vector<64xf32> to vector<64x1xf32>
    %120 = vector.broadcast %119 : vector<64x1xf32> to vector<64x64xf32>
    %121 = arith.subf %117, %120 : vector<64x64xf32>
    %122 = math.exp %121 : vector<64x64xf32>
    %cst_45 = arith.constant dense<0.000000e+00> : vector<64xf32>
    %123 = vector.multi_reduction <add>, %122, %cst_45 [1] : vector<64x64xf32> to vector<64xf32>
    %124 = vector.shape_cast %123 : vector<64xf32> to vector<64x1xf32>
    %125 = tpu.reciprocal %124 {approx = true} : vector<64x1xf32> -> vector<64x1xf32>
    %126 = vector.broadcast %125 : vector<64x1xf32> to vector<64x64xf32>
    %127 = arith.mulf %122, %126 : vector<64x64xf32>
    %cst_46 = arith.constant dense<0.000000e+00> : vector<64x32xf32>
    %128 = tpu.matmul %127, %115, %cst_46 {dimension_numbers = #tpu.dot_dimension_numbers<[1], [0], [0], [1], [0, 0, 1, 1], [], []>} : vector<64x64xf32>, vector<64x32xf32>, vector<64x32xf32> -> vector<64x32xf32>
    %cst_47 = arith.constant dense<0.000000e+00> : vector<64x32xf32>
    %129 = tpu.matmul %128, %103, %cst_47 {dimension_numbers = #tpu.dot_dimension_numbers<[1], [0], [0], [1], [0, 0, 1, 1], [], []>} : vector<64x32xf32>, vector<32x32xf32>, vector<64x32xf32> -> vector<64x32xf32>
    %130 = vector.extract_strided_slice %129 {offsets = [0, 0], sizes = [16, 32], strides = [1, 1]} : vector<64x32xf32> to vector<16x32xf32>
    %131 = vector.extract_strided_slice %129 {offsets = [16, 0], sizes = [16, 32], strides = [1, 1]} : vector<64x32xf32> to vector<16x32xf32>
    %132 = arith.addf %130, %131 : vector<16x32xf32>
    %133 = vector.extract_strided_slice %129 {offsets = [32, 0], sizes = [16, 32], strides = [1, 1]} : vector<64x32xf32> to vector<16x32xf32>
    %134 = arith.addf %132, %133 : vector<16x32xf32>
    %135 = vector.extract_strided_slice %129 {offsets = [48, 0], sizes = [16, 32], strides = [1, 1]} : vector<64x32xf32> to vector<16x32xf32>
    %136 = arith.addf %134, %135 : vector<16x32xf32>
    %137 = vector.broadcast %104 : vector<1x32xf32> to vector<16x32xf32>
    %138 = arith.addf %136, %137 : vector<16x32xf32>
    %139 = arith.addf %100, %138 : vector<16x32xf32>
    %cst_48 = arith.constant dense<0.000000e+00> : vector<16xf32>
    %140 = vector.multi_reduction <add>, %139, %cst_48 [1] : vector<16x32xf32> to vector<16xf32>
    %141 = vector.shape_cast %140 : vector<16xf32> to vector<16x1xf32>
    %cst_49 = arith.constant 3.200000e+01 : f32
    %142 = vector.broadcast %cst_49 : f32 to vector<16x1xf32>
    %143 = arith.divf %141, %142 : vector<16x1xf32>
    %144 = vector.broadcast %143 : vector<16x1xf32> to vector<16x32xf32>
    %145 = arith.subf %139, %144 : vector<16x32xf32>
    %146 = arith.mulf %145, %145 : vector<16x32xf32>
    %cst_50 = arith.constant dense<0.000000e+00> : vector<16xf32>
    %147 = vector.multi_reduction <add>, %146, %cst_50 [1] : vector<16x32xf32> to vector<16xf32>
    %148 = vector.shape_cast %147 : vector<16xf32> to vector<16x1xf32>
    %cst_51 = arith.constant 3.200000e+01 : f32
    %149 = vector.broadcast %cst_51 : f32 to vector<16x1xf32>
    %150 = arith.divf %148, %149 : vector<16x1xf32>
    %151 = vector.broadcast %143 : vector<16x1xf32> to vector<16x32xf32>
    %152 = arith.subf %139, %151 : vector<16x32xf32>
    %cst_52 = arith.constant 9.99999974E-6 : f32
    %153 = vector.broadcast %cst_52 : f32 to vector<16x1xf32>
    %154 = arith.addf %150, %153 : vector<16x1xf32>
    %155 = math.rsqrt %154 : vector<16x1xf32>
    %156 = vector.broadcast %155 : vector<16x1xf32> to vector<16x32xf32>
    %157 = arith.mulf %152, %156 : vector<16x32xf32>
    %158 = vector.broadcast %105 : vector<1x32xf32> to vector<16x32xf32>
    %159 = arith.mulf %157, %158 : vector<16x32xf32>
    %160 = vector.broadcast %106 : vector<1x32xf32> to vector<16x32xf32>
    %161 = arith.addf %159, %160 : vector<16x32xf32>
    %cst_53 = arith.constant 0.000000e+00 : f32
    %162 = vector.broadcast %cst_53 : f32 to vector<16x128xf32>
    %c0_54 = arith.constant 0 : index
    %c0_55 = arith.constant 0 : index
    %163 = vector.load %arg2[%c0_54, %c0_55] : memref<16x128xf32, #tpu.memory_space<vmem>>, vector<16x128xf32>
    tpu.vector_store %arg2[%c0_54, %c0_55], %162 {strides = array<i32>} : memref<16x128xf32, #tpu.memory_space<vmem>>, vector<16x128xf32>,
    %c0_56 = arith.constant 0 : index
    %c0_57 = arith.constant 0 : index
    %164 = vector.load %arg2[%c0_56, %c0_57] : memref<16x128xf32, #tpu.memory_space<vmem>>, vector<16x32xf32>
    tpu.vector_store %arg2[%c0_56, %c0_57], %100 {strides = array<i32>} : memref<16x128xf32, #tpu.memory_space<vmem>>, vector<16x32xf32>,
    %c0_58 = arith.constant 0 : index
    %c32_59 = arith.constant 32 : index
    %165 = vector.load %arg2[%c0_58, %c32_59] : memref<16x128xf32, #tpu.memory_space<vmem>>, vector<16x32xf32>
    tpu.vector_store %arg2[%c0_58, %c32_59], %161 {strides = array<i32>} : memref<16x128xf32, #tpu.memory_space<vmem>>, vector<16x32xf32>,
    %c0_60 = arith.constant 0 : index
    %c64_61 = arith.constant 64 : index
    %166 = vector.load %arg2[%c0_60, %c64_61] : memref<16x128xf32, #tpu.memory_space<vmem>>, vector<16x16xf32>
    tpu.vector_store %arg2[%c0_60, %c64_61], %25 {strides = array<i32>} : memref<16x128xf32, #tpu.memory_space<vmem>>, vector<16x16xf32>,
    %167 = vector.extract_strided_slice %16 {offsets = [0, 0], sizes = [1, 32], strides = [1, 1]} : vector<16x32xf32> to vector<1x32xf32>
    %c0_62 = arith.constant 0 : index
    %c80 = arith.constant 80 : index
    %168 = vector.load %arg2[%c0_62, %c80] : memref<16x128xf32, #tpu.memory_space<vmem>>, vector<1x32xf32>
    tpu.vector_store %arg2[%c0_62, %c80], %167 {strides = array<i32>} : memref<16x128xf32, #tpu.memory_space<vmem>>, vector<1x32xf32>,
    %169 = vector.extract_strided_slice %16 {offsets = [8, 0], sizes = [1, 32], strides = [1, 1]} : vector<16x32xf32> to vector<1x32xf32>
    %c1 = arith.constant 1 : index
    %c80_63 = arith.constant 80 : index
    %170 = vector.load %arg2[%c1, %c80_63] : memref<16x128xf32, #tpu.memory_space<vmem>>, vector<1x32xf32>
    tpu.vector_store %arg2[%c1, %c80_63], %169 {strides = array<i32>} : memref<16x128xf32, #tpu.memory_space<vmem>>, vector<1x32xf32>,
    return
  }
}

</mosaic_0001>

<bundles_post_ra>
// kernel: tpu_custom_call.1
= control target key start
LH: loop header
LB: loop body
LE: loop exit
PB: predicated region body
PF: predicated region fallthrough
CT: control target
= control target key end

     0   :  { %7 = vsyncpa [#allocation3], 0  ;;  %s3386_s0 = inlined_call_operand.vmem [shape: f32[16,1], index: 0, kind: input, shape index: {}]   ;;  %s3387_s1 = inlined_call_operand.hbm [shape: f32[496,128], index: 1, kind: input, shape index: {}]   ;;  %s3388_s2 = inlined_call_operand.hbm [shape: f32[16,128], index: 2, kind: output, shape index: {}]  }
   0x1   :  { %8 = vsyncpa [#allocation4], 0  ;;  %s2791_s9 = smov [#allocation2]  }
   0x2   :  { %s16_s10 = sshll.u32 %s2791_s9, 4  ;;  %s17_s10 = int_to_ptr.vmem [resolvable:$true] %s16_s10 }
   0x3   :  { %s2755_s11 = scalar_lea.vmem %s17_s10, 7936  ;;  %p2760_p1 = scmp.lt.s32.totalorder %s17_s10, %s17_s10 }
   0x4   :  { %p2756_p0 = scmp.ne.s32.totalorder %s17_s10, %s2755_s11  ;;  %p2761_p2 = scmp.lt.s32.totalorder %s2755_s11, %s2755_s11 }
   0x6   :  { %p2762_p3 = por %p2761_p2, %p2760_p1 }
   0x8   :  { %p2763_p4 = pnand %p2762_p3, %p2756_p0 }
   0xa   :  { %2766 = shalt.err (!%p2763_p4)
}
   0xb   :  { %s2792_s12 = smov 128   ;;  %s2793_s13 = smov 8  }
   0xc   :  { %22 = dma.hbm_to_vmem [thread:$0]  %s3387_s1, 7936, %s17_s10, [#allocation3], %s2792_s12, %s2792_s12, %s2793_s13  }
   0xd   :  { %2787 = dma.done.wait [#allocation3], 7936  }
   0xe   :  { %2788 = vsyncadd [#allocation3], 4294959360  ;;  %v2794_v0 = vmov 0   ;;  %v27_v1 = vld [vmem:[%s3386_s0 + $0x8] sm:$0xff]  ;;  %v26_v2 = vld [vmem:[%s3386_s0] sm:$0xff]  ;;  %vm254_vm0 = vcmask 130048  }
   0xf   :  { %2650 = vset.pattern.permute.xlu0 %v2794_v0  ;;  %v29_v3 = vmul.f32 6.2831855, %v27_v1  ;;  %v28_v4 = vmul.f32 6.2831855, %v26_v2  ;;  %v252_v5 = vld [vmem:[#allocation2 + $0x10] sm:$0xff]  ;;  %v31_v6 = vld [vmem:[#allocation2 + $0x8] sm:$0xff] }
  0x10   :  { %2396 = vmatprep.mubr.msk.f32.mxu0 %vm254_vm0, %v252_v5  ;;  %v30_v9 = vld [vmem:[#allocation2] sm:$0xff]  ;;  %v2795_v30 = vmov 2102212464   ;;  %v2796_v32 = vmov 920167782   ;;  %s2801_s0 = smov 32  }
  0x11   :  { %39 = vperm.xlu0 %2650, %v29_v3   ;;  %v2797_v36 = vmov 1326507024   ;;  %v2798_v40 = vmov 683565275   ;;  %v2799_v42 = vmov 2475754826  }
  0x12   :  { %v2800_v44 = vmov 2131351028   ;;  %s2802_s1 = smov 96   ;;  %s2803_s20 = smov 64  }
  0x13   :  { %s2805_s21 = smov 80   ;;  %s2806_s22 = smov [#allocation5]  }
  0x14   :  { %s2157_s23 = sshll.u32 %s2806_s22, 4  ;;  %s2158_s23 = int_to_ptr.vmem [resolvable:$true] %s2157_s23 }
  0x15   :  { %34 = vperm.xlu0 %2650, %v28_v4   ;;  %s2767_s24 = scalar_lea.vmem %s2158_s23, 256  ;;  %p2772_p6 = scmp.lt.s32.totalorder %s2158_s23, %s2158_s23 }
  0x16   :  { %p2768_p5 = scmp.ne.s32.totalorder %s2158_s23, %s2767_s24  ;;  %p2773_p7 = scmp.lt.s32.totalorder %s2767_s24, %s2767_s24 }
  0x18   :  { %p2774_p8 = por %p2773_p7, %p2772_p6 }
  0x1a   :  { %p2775_p9 = pnand %p2774_p8, %p2768_p5 }
  0x8c   :  { %v40_v7 = vpop.permute.xlu0 %39 }
  0x8d   :  { %v2835_v8 = vmul.f32 %v40_v7, %v31_v6 }
  0x8f   :  { %v151_v10 = vand.u32 2139095040, %v2835_v8  ;;  %v148_v17 = vand.u32 2147483647, %v2835_v8 }
  0x90   :  { %v35_v11 = vpop.permute.xlu0 %34 }
  0x91   :  { %v152_v12 = vshrl.u32 %v151_v10, 23  ;;  %v2838_v13 = vmul.f32 %v35_v11, %v30_v9  ;;  %v2847_v22 = vand.u32 8388607, %v148_v17 }
  0x93   :  { %v2173_v14 = vadd.s32 4294967169, %v152_v12  ;;  %v44_v15 = vand.u32 2147483647, %v2838_v13  ;;  %v47_v16 = vand.u32 2139095040, %v2838_v13  ;;  %v156_v29 = vor.u32 8388608, %v2847_v22 }
  0x94   :  { %vm46_vm15 = vcmp.lt.s32.totalorder %v2838_v13, 0 }
  0x95   :  { %v158_v18 = vadd.s32 1, %v2173_v14  ;;  %v48_v19 = vshrl.u32 %v47_v16, 23  ;;  %v51_v20 = vand.u32 8388607, %v44_v15 }
  0x97   :  { %vm159_vm1 = vcmp.gt.s32.totalorder %v158_v18, 0  ;;  %v2169_v21 = vadd.s32 4294967169, %v48_v19  ;;  %v52_v24 = vor.u32 8388608, %v51_v20 }
  0x98   :  { %v160_v23 = vsel %vm159_vm1, %v158_v18, 0  ;;  %vm2918_vm1 = vcmp.le.f32.partialorder %v44_v15, 0.7853982 }
  0x99   :  { %v2849_v25 = vshrl.u32 %v160_v23, 5  ;;  %v162_v26 = vand.u32 31, %v160_v23  ;;  %v54_v27 = vadd.s32 1, %v2169_v21  ;;  %v2854_v34 = vshll.u32 %v52_v24, 8 }
  0x9b   :  { %v2851_v28 = vsub.s32 32, %v162_v26  ;;  %v174_v31 = vshll.u32 %v2795_v30, %v162_v26  ;;  %v177_v33 = vshll.u32 %v2796_v32, %v162_v26  ;;  %vm55_vm2 = vcmp.gt.s32.totalorder %v54_v27, 0 }
  0x9c   :  { %vm183_vm3 = vcmp.lt.s32.totalorder %v2849_v25, 4  ;;  %v56_v38 = vsel %vm55_vm2, %v54_v27, 0  ;;  %v165_v41 = vshll.u32 %v2798_v40, %v162_v26  ;;  %v168_v43 = vshll.u32 %v2799_v42, %v162_v26 }
  0x9d   :  { %v175_v35 = vshrl.u32 %v2796_v32, %v2851_v28  ;;  %v178_v37 = vshrl.u32 %v2797_v36, %v2851_v28  ;;  %v58_v39 = vand.u32 31, %v56_v38  ;;  %v171_v45 = vshll.u32 %v2800_v44, %v162_v26 }
  0x9e   :  { %v57_v47 = vshrl.u32 %v56_v38, 5  ;;  %v166_v48 = vshrl.u32 %v2799_v42, %v2851_v28  ;;  %v169_v49 = vshrl.u32 %v2800_v44, %v2851_v28  ;;  %v172_v53 = vshrl.u32 %v2795_v30, %v2851_v28 }
  0x9f   :  { %v176_v46 = vor.u32 %v175_v35, %v174_v31  ;;  %v179_v50 = vor.u32 %v178_v37, %v177_v33  ;;  %v59_v51 = vsub.s32 32, %v58_v39  ;;  %v61_v52 = vshll.u32 %v2798_v40, %v58_v39 }
  0xa0   :  { %v64_v55 = vshll.u32 %v2799_v42, %v58_v39  ;;  %v67_v56 = vshll.u32 %v2800_v44, %v58_v39  ;;  %v70_v57 = vshll.u32 %v2795_v30, %v58_v39  ;;  %v73_v61 = vshll.u32 %v2796_v32, %v58_v39 }
  0xa1   :  { %v189_v54 = vsel %vm183_vm3, %v176_v46, 920167782  ;;  %v62_v58 = vshrl.u32 %v2799_v42, %v59_v51  ;;  %v65_v59 = vshrl.u32 %v2800_v44, %v59_v51  ;;  %v68_v60 = vshrl.u32 %v2795_v30, %v59_v51 }
  0xa2   :  { %vm180_vm4 = vcmp.lt.s32.totalorder %v2849_v25, 1  ;;  %v60_v62 = vshrl.u32 %v2798_v40, %v59_v51  ;;  %v71_v63 = vshrl.u32 %v2796_v32, %v59_v51  ;;  %v74_v0 = vshrl.u32 %v2797_v36, %v59_v51 }
  0xa3   :  { %vm76_vm5 = vcmp.lt.s32.totalorder %v57_v47, 1  ;;  %v63_v1 = vor.u32 %v62_v58, %v61_v52  ;;  %v66_v2 = vor.u32 %v65_v59, %v64_v55  ;;  %v69_v3 = vor.u32 %v68_v60, %v67_v56 }
  0xa4   :  { %vm78_vm6 = vcmp.lt.s32.totalorder %v57_v47, 3  ;;  %v72_v4 = vor.u32 %v71_v63, %v70_v57  ;;  %v75_v5 = vor.u32 %v74_v0, %v73_v61  ;;  %vm79_vm7 = vcmp.lt.s32.totalorder %v57_v47, 4 }
  0xa5   :  { %v167_v6 = vor.u32 %v166_v48, %v165_v41  ;;  %v80_v7 = vsel %vm76_vm5, %v60_v62, %v63_v1  ;;  %v81_v9 = vsel %vm79_vm7, %v69_v3, 2102212464  ;;  %v84_v10 = vsel %vm76_vm5, %v63_v1, %v66_v2 }
  0xa6   :  { %v88_v11 = vsel %vm76_vm5, %v66_v2, %v69_v3  ;;  %v82_v12 = vsel %vm78_vm6, %v66_v2, %v81_v9  ;;  %v85_v14 = vsel %vm79_vm7, %v72_v4, 920167782  ;;  %v89_v16 = vsel %vm79_vm7, %v75_v5, 1326507024 }
  0xa7   :  { %v170_v18 = vor.u32 %v169_v49, %v168_v43  ;;  %vm77_vm8 = vcmp.lt.s32.totalorder %v57_v47, 2  ;;  %v86_v19 = vsel %vm78_vm6, %v69_v3, %v85_v14  ;;  %v90_v20 = vsel %vm78_vm6, %v72_v4, %v89_v16 }
  0xa8   :  { %v173_v21 = vor.u32 %v172_v53, %v171_v45  ;;  %v193_v23 = vsel %vm183_vm3, %v179_v50, 1326507024  ;;  %v83_v24 = vsel %vm77_vm8, %v80_v7, %v82_v12  ;;  %v87_v26 = vsel %vm77_vm8, %v84_v10, %v86_v19 }
  0xa9   :  { %v91_v27 = vsel %vm77_vm8, %v88_v11, %v90_v20  ;;  %v2872_v32 = vmul.u32.u64.low %v2854_v34, %v87_v26  ;;  %v2873_v33 = vmul.u32.u64.high %v2854_v34, %v87_v26, %v2872_v32  ;;  %v164_v35 = vshrl.u32 %v2798_v40, %v2851_v28 }
  0xaa   :  { %v2868_v30 = vmul.u32.u64.low %v2854_v34, %v91_v27  ;;  %v2869_v31 = vmul.u32.u64.high %v2854_v34, %v91_v27, %v2868_v30  ;;  %vm182_vm9 = vcmp.lt.s32.totalorder %v2849_v25, 3  ;;  %v185_v36 = vsel %vm183_vm3, %v173_v21, 2102212464 }
  0xab   :  { %v188_v37 = vsel %vm180_vm4, %v167_v6, %v170_v18  ;;  %vm181_vm10 = vcmp.lt.s32.totalorder %v2849_v25, 2  ;;  %v190_v38 = vsel %vm182_vm9, %v173_v21, %v189_v54  ;;  %v192_v39 = vsel %vm180_vm4, %v170_v18, %v173_v21 }
  0xac   :  { %v194_v41 = vsel %vm182_vm9, %v176_v46, %v193_v23  ;;  %v99_v28 = vmul.u32 %v2854_v34, %v83_v24  ;;  %v191_v40 = vsel %vm181_vm10, %v188_v37, %v190_v38  ;;  %v196_v43 = vshll.u32 %v156_v29, 8 }
  0xad   :  { %v195_v42 = vsel %vm181_vm10, %v192_v39, %v194_v41  ;;  %vm101_vm11 = vc.u32 %v2869_v31, %v2872_v32  ;;  %v102_v44 = vadd.s32 1, %v2873_v33  ;;  %v184_v45 = vsel %vm180_vm4, %v164_v35, %v167_v6 }
  0xae   :  { %v186_v46 = vsel %vm182_vm9, %v170_v18, %v185_v36  ;;  %v2901_v34 = vmul.u32.u64.low %v196_v43, %v195_v42  ;;  %v2902_v47 = vmul.u32.u64.high %v196_v43, %v195_v42, %v2901_v34  ;;  %v100_v6 = vadd.s32 %v2872_v32, %v2869_v31 }
  0xaf   :  { %v2904_v48 = vmul.u32.u64.low %v196_v43, %v191_v40  ;;  %v2905_v49 = vmul.u32.u64.high %v196_v43, %v191_v40, %v2904_v48  ;;  %v103_v50 = vsel %vm101_vm11, %v102_v44, %v2873_v33  ;;  %v187_v29 = vsel %vm181_vm10, %v184_v45, %v186_v46 }
  0xb0   :  { %v104_v22 = vadd.s32 %v103_v50, %v99_v28  ;;  %v203_v53 = vmul.u32 %v196_v43, %v187_v29  ;;  %vm150_vm2 = vcmp.lt.s32.totalorder %v2835_v8, 0  ;;  %vm149_vm3 = vcmp.le.f32.partialorder %v148_v17, 0.7853982 }
  0xb1   :  { %vm205_vm12 = vc.u32 %v2902_v47, %v2904_v48  ;;  %v206_v52 = vadd.s32 1, %v2905_v49  ;;  %v204_v20 = vadd.s32 %v2904_v48, %v2902_v47  ;;  %vm240_vm10 = vweird.f32 %v2835_v8 }
  0xb2   :  { %v105_v51 = vadd.s32 536870912, %v104_v22  ;;  %vm136_vm11 = vweird.f32 %v2838_v13 }
  0xb3   :  { %v207_v55 = vsel %vm205_vm12, %v206_v52, %v2905_v49  ;;  %vm338_vm12 = vcmask 261120  }
  0xb4   :  { %v106_v54 = vshrl.u32 %v105_v51, 30  ;;  %v208_v56 = vadd.s32 %v207_v55, %v203_v53 }
  0xb6   :  { %v107_v57 = vshll.u32 %v106_v54, 30  ;;  %v209_v58 = vadd.s32 536870912, %v208_v56  ;;  %v130_v43 = vsub.s32 4, %v106_v54 }
  0xb8   :  { %v108_v59 = vsub.s32 %v104_v22, %v107_v57  ;;  %v210_v60 = vshrl.u32 %v209_v58, 30  ;;  %v131_v15 = vsel %vm46_vm15, %v130_v43, %v106_v54 }
  0xb9   :  { %v133_v49 = vsel %vm2918_vm1, 0, %v131_v15 }
  0xba   :  { %v110_v61 = vsub.s32 0, %v108_v59  ;;  %v211_v62 = vshll.u32 %v210_v60, 30  ;;  %v234_v46 = vsub.s32 4, %v210_v60  ;;  %v137_v22 = vadd.s32 3, %v133_v49  ;;  %v461_v49 = vld [vmem:[#allocation2 + $0x61] sm:$0xff] }
  0xbc   :  { %v2170_v63 = vmin.u32 %v110_v61, %v108_v59  ;;  %v212_v0 = vsub.s32 %v208_v56, %v211_v62  ;;  %v235_v48 = vsel %vm150_vm2, %v234_v46, %v210_v60  ;;  %v138_v52 = vand.u32 3, %v137_v22  ;;  %v459_v22 = vld [vmem:[#allocation2 + $0x51] sm:$0xff] }
  0xbd   :  { %v237_v50 = vsel %vm149_vm3, 0, %v235_v48  ;;  %v462_v48 = vld [vmem:[#allocation2 + $0x69] sm:$0xff] }
  0xbe   :  { %v112_v25 = vclz %v2170_v63  ;;  %v214_v1 = vsub.s32 0, %v212_v0  ;;  %v241_v29 = vadd.s32 3, %v237_v50  ;;  %vm140_vm4 = vcmp.eq.s32.totalorder %v138_v52, 0  ;;  %v460_v50 = vld [vmem:[#allocation2 + $0x59] sm:$0xff] }
  0xbf   :  { %vm143_vm5 = vcmp.eq.s32.totalorder %v138_v52, 2  ;;  %vm139_vm7 = vcmp.lt.s32.totalorder %v138_v52, 2 }
  0xc0   :  { %v2171_v2 = vadd.s32 4294967294, %v112_v25  ;;  %v2174_v3 = vmin.u32 %v214_v1, %v212_v0  ;;  %v242_v57 = vand.u32 3, %v241_v29  ;;  %v2179_v29 = vld [vmem:[#allocation2 + $0x40] ss:$0 sm:$0xff] }
  0xc2   :  { %vm2172_vm13 = vcmp.lt.s32.totalorder %v2171_v2, 0  ;;  %v216_v5 = vclz %v2174_v3  ;;  %vm247_vm6 = vcmp.eq.s32.totalorder %v242_v57, 2  ;;  %vm244_vm8 = vcmp.eq.s32.totalorder %v242_v57, 0  ;;  %v253_v3 = vld [vmem:[#allocation2 + $0x18] sm:$0xff] }
  0xc3   :  { %v115_v4 = vsel %vm2172_vm13, 0, %v2171_v2  ;;  %vm243_vm9 = vcmp.lt.s32.totalorder %v242_v57, 2 }
  0xc4   :  { %v116_v7 = vsub.s32 32, %v115_v4  ;;  %v120_v9 = vsub.s32 4294967266, %v115_v4  ;;  %v2175_v10 = vadd.s32 4294967294, %v216_v5  ;;  %v117_v11 = vshll.u32 %v108_v59, %v115_v4 }
  0xc6   :  { %v118_v12 = vshrl.u32 %v100_v6, %v116_v7  ;;  %v121_v14 = vadd.s32 127, %v120_v9  ;;  %vm2176_vm14 = vcmp.lt.s32.totalorder %v2175_v10, 0  ;;  %v368_v9 = vld [vmem:[#allocation2 + $0x38] sm:$0xff] }
  0xc7   :  { %v219_v19 = vsel %vm2176_vm14, 0, %v2175_v10  ;;  %v367_v10 = vld [vmem:[#allocation2 + $0x30] sm:$0xff]  ;;  %2399 = vmatprep.subr.mxu1 %v368_v9 }
  0xc8   :  { %v119_v16 = vor.u32 %v118_v12, %v117_v11  ;;  %v122_v18 = vshll.u32 %v121_v14, 23  ;;  %v220_v21 = vsub.s32 32, %v219_v19  ;;  %v224_v23 = vsub.s32 4294967266, %v219_v19  ;;  %2400 = vmatpush3.msra.mxu1 %v368_v9  ;;  %v366_v11 = vld [vmem:[#allocation2 + $0x28] sm:$0xff]  ;;  %v365_v12 = vld [vmem:[#allocation2 + $0x20] sm:$0xff] }
  0xc9   :  { %v221_v26 = vshll.u32 %v212_v0, %v219_v19  ;;  %2401 = vmatprep.subr.mxu1 %v367_v10  ;;  %v474_v14 = vld [vmem:[#allocation2 + $0xc9] sm:$0xff]  ;;  %v471_v19 = vld [vmem:[#allocation2 + $0xb1] sm:$0xff] }
  0xca   :  { %v123_v24 = vor.u32 4788187, %v122_v18  ;;  %v222_v27 = vshrl.u32 %v204_v20, %v220_v21  ;;  %v225_v30 = vadd.s32 127, %v224_v23  ;;  %v126_v31 = vcvt.s32.f32 %v119_v16  ;;  %2402 = vmatpush3.msra.mxu1 %v367_v10  ;;  %v473_v16 = vld [vmem:[#allocation2 + $0xc1] sm:$0xff]  ;;  %v472_v18 = vld [vmem:[#allocation2 + $0xb9] sm:$0xff]  ;;  %v470_v20 = vld [vmem:[#allocation2 + $0xa9] sm:$0xff] }
  0xcb   :  { %2403 = vmatprep.subr.mxu1 %v366_v11  ;;  %v469_v21 = vld [vmem:[#allocation2 + $0xa1] sm:$0xff]  ;;  %v468_v23 = vld [vmem:[#allocation2 + $0x99] sm:$0xff] }
  0xcc   :  { %v124_v33 = vand.u32 2147483647, %v123_v24  ;;  %v223_v32 = vor.u32 %v222_v27, %v221_v26  ;;  %v226_v35 = vshll.u32 %v225_v30, 23  ;;  %2404 = vmatpush3.msra.mxu1 %v366_v11  ;;  %v467_v24 = vld [vmem:[#allocation2 + $0x91] sm:$0xff]  ;;  %v466_v26 = vld [vmem:[#allocation2 + $0x89] sm:$0xff]  ;;  %v465_v27 = vld [vmem:[#allocation2 + $0x81] sm:$0xff] }
  0xcd   :  { %2405 = vmatprep.subr.mxu1 %v365_v12  ;;  %v464_v30 = vld [vmem:[#allocation2 + $0x79] sm:$0xff] }
  0xce   :  { %v127_v36 = vmul.f32 %v126_v31, %v124_v33  ;;  %v227_v37 = vor.u32 4788187, %v226_v35  ;;  %v230_v41 = vcvt.s32.f32 %v223_v32  ;;  %2406 = vmatpush3.msra.mxu1 %v365_v12  ;;  %v463_v33 = vld [vmem:[#allocation2 + $0x71] sm:$0xff] }
  0xd0   :  { %v128_v38 = vxor.u32 2147483648, %v127_v36  ;;  %v228_v39 = vand.u32 2147483647, %v227_v37 }
  0xd2   :  { %v129_v28 = vsel %vm46_vm15, %v128_v38, %v127_v36  ;;  %v231_v42 = vmul.f32 %v230_v41, %v228_v39 }
  0xd3   :  { %v132_v44 = vsel %vm2918_vm1, %v2838_v13, %v129_v28 }
  0xd4   :  { %2651 = vcosq.f32 %v132_v44  ;;  %v232_v45 = vxor.u32 2147483648, %v231_v42 }
  0xd5   :  { %2653 = vsinq.f32 %v132_v44 }
  0xd6   :  { %v233_v34 = vsel %vm150_vm2, %v232_v45, %v231_v42  ;;  %vm2129_vm2 = vcmask 523520  }
  0xd7   :  { %v236_v47 = vsel %vm149_vm3, %v2835_v8, %v233_v34  ;;  %vm2140_vm3 = vcmask 654848  }
  0xd8   :  { %2655 = vcosq.f32 %v236_v47 }
  0xd9   :  { %2657 = vsinq.f32 %v236_v47 }
  0xe1   :  { %v2652_v51 = vpop.eup %2651 }
  0xe2   :  { %v2654_v53 = vpop.eup %2653  ;;  %v144_v55 = vxor.u32 2147483648, %v2652_v51 }
  0xe3   :  { %v141_v56 = vxor.u32 2147483648, %v2654_v53 }
  0xe4   :  { %v145_v58 = vsel %vm143_vm5, %v144_v55, %v2654_v53  ;;  %v455_v55 = vld [vmem:[#allocation2 + $0x41] sm:$0xff] }
  0xe5   :  { %v2656_v17 = vpop.eup %2655  ;;  %v142_v54 = vsel %vm140_vm4, %v2652_v51, %v141_v56  ;;  %v456_v56 = vld [vmem:[#allocation2 + $0x49] sm:$0xff]  ;;  %vm2146_vm4 = vcmask 909952  }
  0xe6   :  { %v2658_v59 = vpop.eup %2657  ;;  %v248_v60 = vxor.u32 2147483648, %v2656_v17  ;;  %v146_v63 = vsel %vm139_vm7, %v142_v54, %v145_v58 }
  0xe7   :  { %v245_v61 = vxor.u32 2147483648, %v2658_v59  ;;  %v147_v2 = vsel %vm136_vm11, nan, %v146_v63 }
  0xe8   :  { %v249_v62 = vsel %vm247_vm6, %v248_v60, %v2658_v59 }
  0xe9   :  { %v246_v0 = vsel %vm244_vm8, %v2656_v17, %v245_v61 }
  0xea   :  { %v250_v25 = vsel %vm243_vm9, %v246_v0, %v249_v62 }
  0xeb   :  { %v251_v1 = vsel %vm240_vm10, nan, %v250_v25 }
  0xec   :  { %2392 = vmatprep.subr.mxu0 %v251_v1 }
  0xed   :  { %2393 = vmatpush3.msra.mxu0 %v251_v1 }
  0xee   :  { %2394 = vmatprep.subr.mxu0 %v147_v2 }
  0xef   :  { %2395 = vmatpush3.msra.mxu0 %v147_v2 }
  0xf0   :  { %2397 = vmatmul.mubr.msk.f32.vlgmr.msra.gmra.mxu0 %vm254_vm0, %v253_v3  ;;  %2410 = vmatprep.subr.mxu0 %v474_v14 }
  0xf1   :  { %2411 = vmatpush3.msra.mxu0 %v474_v14 }
  0xf2   :  { %2412 = vmatprep.subr.mxu0 %v473_v16 }
  0xf3   :  { %2413 = vmatpush3.msra.mxu0 %v473_v16 }
  0xf4   :  { %2414 = vmatprep.subr.mxu0 %v472_v18 }
  0xf5   :  { %2415 = vmatpush3.msra.mxu0 %v472_v18  ;;  %v673_v18 = vld [vmem:[#allocation2 + $0x171] sm:$0xff] }
  0xf6   :  { %2416 = vmatprep.subr.mxu0 %v471_v19 }
  0xf7   :  { %2417 = vmatpush3.msra.mxu0 %v471_v19  ;;  %v672_v19 = vld [vmem:[#allocation2 + $0x169] sm:$0xff] }
  0xf8   :  { %2418 = vmatprep.subr.mxu0 %v470_v20 }
  0xf9   :  { %2419 = vmatpush3.msra.mxu0 %v470_v20  ;;  %v671_v20 = vld [vmem:[#allocation2 + $0x161] sm:$0xff] }
  0xfa   :  { %2420 = vmatprep.subr.mxu0 %v469_v21 }
  0xfb   :  { %2421 = vmatpush3.msra.mxu0 %v469_v21  ;;  %v662_v21 = vld [vmem:[#allocation2 + $0x119] sm:$0xff] }
  0xfc   :  { %2422 = vmatprep.subr.mxu0 %v468_v23 }
  0xfd   :  { %2423 = vmatpush3.msra.mxu0 %v468_v23  ;;  %v661_v23 = vld [vmem:[#allocation2 + $0x111] sm:$0xff] }
  0xfe   :  { %2424 = vmatprep.subr.mxu0 %v467_v24 }
  0xff   :  { %2425 = vmatpush3.msra.mxu0 %v467_v24  ;;  %v660_v24 = vld [vmem:[#allocation2 + $0x109] sm:$0xff] }
 0x100   :  { %2426 = vmatprep.subr.mxu0 %v466_v26 }
 0x101   :  { %2427 = vmatpush3.msra.mxu0 %v466_v26  ;;  %v659_v26 = vld [vmem:[#allocation2 + $0x101] sm:$0xff] }
 0x102   :  { %2428 = vmatprep.subr.mxu0 %v465_v27 }
 0x103   :  { %2429 = vmatpush3.msra.mxu0 %v465_v27  ;;  %v658_v27 = vld [vmem:[#allocation2 + $0xf9] sm:$0xff] }
 0x104   :  { %2430 = vmatprep.subr.mxu0 %v464_v30 }
 0x105   :  { %2431 = vmatpush3.msra.mxu0 %v464_v30  ;;  %v657_v30 = vld [vmem:[#allocation2 + $0xf1] sm:$0xff] }
 0x106   :  { %2432 = vmatprep.subr.mxu0 %v463_v33 }
 0x107   :  { %2433 = vmatpush3.msra.mxu0 %v463_v33  ;;  %v656_v33 = vld [vmem:[#allocation2 + $0xe9] sm:$0xff] }
 0x108   :  { %2434 = vmatprep.subr.mxu0 %v462_v48 }
 0x109   :  { %2435 = vmatpush3.msra.mxu0 %v462_v48 }
 0x10a   :  { %2436 = vmatprep.subr.mxu0 %v461_v49 }
 0x10b   :  { %2437 = vmatpush3.msra.mxu0 %v461_v49 }
 0x10c   :  { %2438 = vmatprep.subr.mxu0 %v460_v50 }
 0x10d   :  { %2439 = vmatpush3.msra.mxu0 %v460_v50 }
 0x10e   :  { %2440 = vmatprep.subr.mxu0 %v459_v22 }
 0x10f   :  { %2441 = vmatpush3.msra.mxu0 %v459_v22 }
 0x1b0   :  { %v2934_v4 = vpop.f32.mrf.mxu0 }
 0x1b1   :  { %v337_v8 = vmul.f32 %v2934_v4, %v2934_v4 }
 0x1b2   :  { %v2936_v5 = vpop.f32.mrf.mxu0 }
 0x1b3   :  { %v336_v6 = vmul.f32 %v2936_v5, %v2936_v5  ;;  %v342_v7 = vsel %vm338_vm12, %v337_v8, 0.0  ;;  %v573_v8 = vld [vmem:[#allocation2 + $0xd9] sm:$0xff] }
 0x1b4   :  { %2445 = vmatprep.subr.mxu1 %v573_v8 }
 0x1b5   :  { %v339_v13 = vsel %vm338_vm12, %v336_v6, 0.0 }
 0x1b6   :  { %340 = vadd.xlane.f32.xlu1 %v339_v13  ;;  %v572_v13 = vld [vmem:[#allocation2 + $0xd1] sm:$0xff] }
 0x1ba   :  { %343 = vadd.xlane.f32.xlu1 %v342_v7  ;;  %v674_v7 = vld [vmem:[#allocation2 + $0x179] sm:$0xff] }
 0x23f   :  { %v341_v31 = vpop.xlane.xlu1 %340 }
 0x240   :  { %2659 = vrsqrt.f32 %v341_v31  ;;  %vm347_vm13 = vcmp.eq.f32.partialorder %v341_v31, inf  ;;  %v350_v37 = vand.u32 2147483648, %v341_v31  ;;  %vm349_vm14 = vcmp.eq.f32.partialorder %v341_v31, 0.0 }
 0x243   :  { %v344_v32 = vpop.xlane.xlu1 %343 }
 0x244   :  { %2661 = vrsqrt.f32 %v344_v32  ;;  %vm354_vm15 = vcmp.eq.f32.partialorder %v344_v32, inf  ;;  %v357_v42 = vand.u32 2147483648, %v344_v32  ;;  %vm356_vm1 = vcmp.eq.f32.partialorder %v344_v32, 0.0 }
 0x24d   :  { %v2660_v35 = vpop.eup %2659 }
 0x24e   :  { %v346_v36 = vmul.f32 %v2660_v35, %v341_v31 }
 0x250   :  { %v348_v38 = vsel %vm347_vm13, %v341_v31, %v346_v36  ;;  %v655_v31 = vld [vmem:[#allocation2 + $0xe1] sm:$0xff] }
 0x251   :  { %v2662_v39 = vpop.eup %2661  ;;  %v351_v41 = vsel %vm349_vm14, %v350_v37, %v348_v38 }
 0x252   :  { %v353_v28 = vmul.f32 %v2662_v39, %v344_v32  ;;  %v359_v40 = vadd.f32 1e-08, %v351_v41  ;;  %v2184_v41 = vld [vmem:[#allocation2 + $0x181] ss:$0 sm:$0xff] }
 0x254   :  { %v355_v43 = vsel %vm354_vm15, %v344_v32, %v353_v28  ;;  %2663 = vrcp.f32 %v359_v40 }
 0x255   :  { %v358_v44 = vsel %vm356_vm1, %v357_v42, %v355_v43 }
 0x256   :  { %v360_v45 = vadd.f32 1e-08, %v358_v44 }
 0x258   :  { %2665 = vrcp.f32 %v360_v45 }
 0x261   :  { %v2664_v46 = vpop.eup %2663 }
 0x262   :  { %v2945_v34 = vmul.f32 %v2664_v46, %v2936_v5 }
 0x264   :  { %2407 = vmatprep.mubr.msk.f32.mxu1 %vm338_vm12, %v2945_v34 }
 0x265   :  { %v2666_v15 = vpop.eup %2665 }
 0x266   :  { %v2950_v47 = vmul.f32 %v2666_v15, %v2934_v4 }
 0x268   :  { %2408 = vmatmul.mubr.msk.f32.vlgmr.msra.gmra.mxu1 %vm338_vm12, %v2950_v47 }
 0x269   :  { %2446 = vmatpush3.msra.mxu1 %v573_v8 }
 0x26a   :  { %2447 = vmatprep.subr.mxu1 %v572_v13 }
 0x26b   :  { %2448 = vmatpush3.msra.mxu1 %v572_v13 }
 0x26c   :  { %2452 = vmatprep.subr.mxu1 %v674_v7 }
 0x328   :  { %v2409_v51 = vpop.f32.mrf.mxu1 }
 0x329   :  { %v452_v52 = vadd.f32 %v2409_v51, %v2179_v29 }
 0x32a   :  { %v446_v53 = vpop.f32.mrf.mxu1 }
 0x32b   :  { %v447_v57 = vadd.f32 %v2179_v29, %v446_v53  ;;  %v458_v54 = vmul.f32 %v456_v56, %v452_v52 }
 0x32d   :  { %v457_v17 = vmul.f32 %v455_v55, %v447_v57 }
 0x32f   :  { %2442 = vmatprep.mubr.f32.mxu0 %v457_v17 }
 0x330   :  { %2443 = vmatmul.mubr.f32.vlgmr.msra.gmra.mxu0 %v458_v54 }
 0x3f0   :  { %v2954_v58 = vpop.f32.mrf.mxu0 }
 0x3f1   :  { %v553_v59 = vsel %vm254_vm0, %v2954_v58, -inf }
 0x3f2   :  { %554 = vmax.xlane.f32.xlu1 %v553_v59  ;;  %v2958_v60 = vpop.f32.mrf.mxu0 }
 0x3f3   :  { %v550_v61 = vsel %vm254_vm0, %v2958_v60, -inf }
 0x3f4   :  { %551 = vmax.xlane.f32.xlu0 %v550_v61 }
 0x40a   :  { %786 = vrot.lane.b32.xlu0 %v660_v24, %s2801_s0 }
 0x47b   :  { %v555_v62 = vpop.xlane.xlu1 %554 }
 0x47c   :  { %v557_v63 = vsub.f32 %v2954_v58, %v555_v62 }
 0x47d   :  { %v552_v0 = vpop.xlane.xlu0 %551 }
 0x47e   :  { %v556_v25 = vsub.f32 %v2958_v60, %v552_v0  ;;  %v560_v1 = vmul.f32 1.442695, %v557_v63  ;;  %v3068_v63 = vld [vmem:[#allocation2 + $0x129] sm:$0xff] }
 0x480   :  { %v558_v2 = vmul.f32 1.442695, %v556_v25  ;;  %v3070_v25 = vld [vmem:[#allocation2 + $0x121] sm:$0xff] }
 0x481   :  { %v3000_v46 = vpop.permute.xlu0 %786 }
 0x482   :  { %2667 = vpow2.f32 %v558_v2 }
 0x483   :  { %2669 = vpow2.f32 %v560_v1 }
 0x48f   :  { %v2668_v3 = vpop.eup %2667 }
 0x490   :  { %v562_v4 = vsel %vm254_vm0, %v2668_v3, 0.0  ;;  %v2670_v5 = vpop.eup %2669 }
 0x491   :  { %563 = vadd.xlane.f32.xlu1 %v562_v4  ;;  %v565_v6 = vsel %vm254_vm0, %v2670_v5, 0.0 }
 0x495   :  { %566 = vadd.xlane.f32.xlu1 %v565_v6 }
 0x4a6   :  { %790 = vrot.lane.b32.xlu1 %v662_v21, %s2801_s0 }
 0x4aa   :  { %788 = vrot.lane.b32.xlu1 %v661_v23, %s2801_s0 }
 0x4ae   :  { %784 = vrot.lane.b32.xlu1 %v659_v26, %s2801_s0 }
 0x4b2   :  { %782 = vrot.lane.b32.xlu1 %v658_v27, %s2801_s0 }
 0x4b6   :  { %780 = vrot.lane.b32.xlu1 %v657_v30, %s2801_s0 }
 0x4ba   :  { %778 = vrot.lane.b32.xlu1 %v656_v33, %s2801_s0 }
 0x4be   :  { %776 = vrot.lane.b32.xlu1 %v655_v31, %s2801_s0 }
 0x51a   :  { %v564_v9 = vpop.xlane.xlu1 %563 }
 0x51b   :  { %2671 = vrcp.f32 %v564_v9  ;;  %v3081_v9 = vld [vmem:[#allocation2 + $0x131] sm:$0xff] }
 0x51e   :  { %v567_v10 = vpop.xlane.xlu1 %566 }
 0x51f   :  { %2673 = vrcp.f32 %v567_v10 }
 0x522   :  { %v2984_v36 = vpop.permute.xlu1 %790 }
 0x526   :  { %v2986_v37 = vpop.permute.xlu1 %788 }
 0x528   :  { %v2672_v11 = vpop.eup %2671 }
 0x529   :  { %v570_v12 = vmul.f32 %v2672_v11, %v2668_v3  ;;  %v3073_v3 = vld [vmem:[#allocation2 + $0x139] sm:$0xff] }
 0x52a   :  { %v2988_v38 = vpop.permute.xlu1 %784 }
 0x52b   :  { %2449 = vmatprep.mubr.msk.f32.mxu1 %vm254_vm0, %v570_v12 }
 0x52c   :  { %v2674_v14 = vpop.eup %2673 }
 0x52d   :  { %v571_v16 = vmul.f32 %v2674_v14, %v2670_v5  ;;  %v3086_v14 = vld [vmem:[#allocation2 + $0x149] sm:$0xff] }
 0x52e   :  { %v2990_v39 = vpop.permute.xlu1 %782 }
 0x52f   :  { %2450 = vmatmul.mubr.msk.f32.vlgmr.msra.gmra.mxu1 %vm254_vm0, %v571_v16  ;;  %vm991_vm0 = vcmask 523264  }
 0x530   :  { %2453 = vmatpush3.msra.mxu1 %v674_v7 }
 0x531   :  { %2454 = vmatprep.subr.mxu1 %v673_v18 }
 0x532   :  { %2455 = vmatpush3.msra.mxu1 %v673_v18  ;;  %v2994_v42 = vpop.permute.xlu1 %780 }
 0x533   :  { %2456 = vmatprep.subr.mxu1 %v672_v19 }
 0x534   :  { %2457 = vmatpush3.msra.mxu1 %v672_v19 }
 0x535   :  { %2458 = vmatprep.subr.mxu1 %v671_v20 }
 0x536   :  { %2459 = vmatpush3.msra.mxu1 %v671_v20  ;;  %v3010_v49 = vpop.permute.xlu1 %778  ;;  %v3090_v20 = vld [vmem:[#allocation2 + $0x159] sm:$0xff] }
 0x53a   :  { %v3021_v51 = vpop.permute.xlu1 %776 }
 0x5ef   :  { %v2976_v32 = vpop.f32.mrf.mxu1 }
 0x5f1   :  { %v2978_v35 = vpop.f32.mrf.mxu1 }
 0x5f2   :  { %2460 = vmatprep.mubr.msk.f32.mxu1 %vm338_vm12, %v2978_v35 }
 0x5f3   :  { %2461 = vmatmul.mubr.msk.f32.vlgmr.msra.gmra.mxu1 %vm338_vm12, %v2976_v32 }
 0x6b3   :  { %v2462_v28 = vpop.f32.mrf.mxu1 }
 0x6b4   :  { %v2992_v40 = vadd.f32 %v2462_v28, %v2184_v41 }
 0x6b5   :  { %v759_v43 = vpop.f32.mrf.mxu1 }
 0x6b6   :  { %v2996_v44 = vadd.f32 %v2184_v41, %v759_v43  ;;  %v807_v45 = vmul.f32 %v2984_v36, %v2992_v40  ;;  %v805_v48 = vmul.f32 %v3000_v46, %v2992_v40  ;;  %v803_v22 = vmul.f32 %v2990_v39, %v2992_v40  ;;  %v3110_v43 = vld [vmem:[#allocation2 + $0x141] sm:$0xff] }
 0x6b7   :  { %v801_v52 = vmul.f32 %v3010_v49, %v2992_v40 }
 0x6b8   :  { %2479 = vmatprep.mubr.msk.f32.mxu1 %vm338_vm12, %v2996_v44  ;;  %862 = vrot.lane.b32.xlu0 %v807_v45, %s2802_s1  ;;  %v806_v15 = vmul.f32 %v2986_v37, %v2996_v44  ;;  %v804_v50 = vmul.f32 %v2988_v38, %v2996_v44  ;;  %v802_v29 = vmul.f32 %v2994_v42, %v2996_v44 }
 0x6b9   :  { %v800_v53 = vmul.f32 %v3021_v51, %v2996_v44 }
 0x6ba   :  { %860 = vrot.lane.b32.xlu1 %v806_v15, %s2802_s1 }
 0x6bc   :  { %858 = vrot.lane.b32.xlu0 %v805_v48, %s2802_s1  ;;  %v3115_v48 = vld [vmem:[#allocation2 + $0x151] sm:$0xff] }
 0x6be   :  { %856 = vrot.lane.b32.xlu1 %v804_v50, %s2802_s1 }
 0x6c0   :  { %854 = vrot.lane.b32.xlu0 %v803_v22, %s2802_s1 }
 0x6c2   :  { %852 = vrot.lane.b32.xlu1 %v802_v29, %s2802_s1 }
 0x6c4   :  { %850 = vrot.lane.b32.xlu0 %v801_v52, %s2802_s1 }
 0x6c6   :  { %848 = vrot.lane.b32.xlu1 %v800_v53, %s2802_s1 }
 0x6c8   :  { %820 = vrot.lane.b32.xlu0 %v661_v23, %s2803_s20 }
 0x6ca   :  { %822 = vrot.lane.b32.xlu1 %v662_v21, %s2803_s20 }
 0x6cc   :  { %814 = vrot.lane.b32.xlu0 %v658_v27, %s2803_s20 }
 0x6ce   :  { %818 = vrot.lane.b32.xlu1 %v660_v24, %s2803_s20 }
 0x6d0   :  { %810 = vrot.lane.b32.xlu0 %v656_v33, %s2803_s20 }
 0x6d2   :  { %816 = vrot.lane.b32.xlu1 %v659_v26, %s2803_s20 }
 0x6d6   :  { %812 = vrot.lane.b32.xlu1 %v657_v30, %s2803_s20 }
 0x6da   :  { %808 = vrot.lane.b32.xlu1 %v655_v31, %s2803_s20 }
 0x72a   :  { %v863_v55 = vpop.permute.xlu0 %862 }
 0x72b   :  { %2463 = vmatprep.subr.msk.mxu1 %vm338_vm12, %v863_v55 }
 0x72c   :  { %v861_v56 = vpop.permute.xlu1 %860  ;;  %2464 = vmatpush3.xpose.msk.msra.mxu1 %vm338_vm12, %v863_v55 }
 0x72d   :  { %2465 = vmatprep.subr.msk.mxu1 %vm338_vm12, %v861_v56 }
 0x72e   :  { %v859_v57 = vpop.permute.xlu0 %858 }
 0x730   :  { %2466 = vmatpush3.xpose.msk.msra.mxu1 %vm338_vm12, %v861_v56  ;;  %v857_v17 = vpop.permute.xlu1 %856 }
 0x731   :  { %2467 = vmatprep.subr.msk.mxu1 %vm338_vm12, %v859_v57 }
 0x732   :  { %v855_v54 = vpop.permute.xlu0 %854 }
 0x734   :  { %2468 = vmatpush3.xpose.msk.msra.mxu1 %vm338_vm12, %v859_v57  ;;  %v853_v59 = vpop.permute.xlu1 %852 }
 0x735   :  { %2469 = vmatprep.subr.msk.mxu1 %vm338_vm12, %v857_v17 }
 0x736   :  { %v851_v61 = vpop.permute.xlu0 %850 }
 0x738   :  { %2470 = vmatpush3.xpose.msk.msra.mxu1 %vm338_vm12, %v857_v17  ;;  %v849_v62 = vpop.permute.xlu1 %848 }
 0x739   :  { %2471 = vmatprep.subr.msk.mxu1 %vm338_vm12, %v855_v54 }
 0x73a   :  { %v3100_v33 = vpop.permute.xlu0 %820 }
 0x73b   :  { %v838_v31 = vmul.f32 %v3100_v33, %v2996_v44 }
 0x73c   :  { %2472 = vmatpush3.xpose.msk.msra.mxu1 %vm338_vm12, %v855_v54  ;;  %v3092_v23 = vpop.permute.xlu1 %822 }
 0x73d   :  { %2473 = vmatprep.subr.msk.mxu1 %vm338_vm12, %v853_v59  ;;  %v839_v27 = vmul.f32 %v3092_v23, %v2992_v40 }
 0x73e   :  { %v3104_v41 = vpop.permute.xlu0 %814 }
 0x73f   :  { %v835_v28 = vmul.f32 %v3104_v41, %v2992_v40 }
 0x740   :  { %2474 = vmatpush3.xpose.msk.msra.mxu1 %vm338_vm12, %v853_v59  ;;  %v3124_v52 = vpop.permute.xlu1 %818 }
 0x741   :  { %2475 = vmatprep.subr.msk.mxu1 %vm338_vm12, %v851_v61  ;;  %v837_v55 = vmul.f32 %v3124_v52, %v2992_v40 }
 0x742   :  { %v3141_v59 = vpop.permute.xlu0 %810 }
 0x744   :  { %2476 = vmatpush3.xpose.msk.msra.mxu1 %vm338_vm12, %v851_v61  ;;  %v3126_v53 = vpop.permute.xlu1 %816 }
 0x745   :  { %2477 = vmatprep.subr.msk.mxu1 %vm338_vm12, %v849_v62  ;;  %v836_v56 = vmul.f32 %v3126_v53, %v2996_v44 }
 0x748   :  { %2478 = vmatpush3.xpose.msk.msra.mxu1 %vm338_vm12, %v849_v62  ;;  %v3133_v57 = vpop.permute.xlu1 %812 }
 0x749   :  { %v834_v17 = vmul.f32 %v3133_v57, %v2996_v44 }
 0x74b   :  { %2480 = vmatmul.mubr.msk.f32.vlgmr.msra.gmra.mxu1 %vm338_vm12, %v2992_v40 }
 0x74c   :  { %2482 = vmatprep.mubr.msk.f32.mxu1 %vm338_vm12, %v2996_v44  ;;  %v3139_v54 = vpop.permute.xlu1 %808 }
 0x74f   :  { %2483 = vmatmul.mubr.msk.f32.gmra.mxu1 %vm338_vm12, %v2992_v40 }
 0x750   :  { %2485 = vmatprep.mubr.msk.f32.mxu1 %vm338_vm12, %v2996_v44 }
 0x753   :  { %2486 = vmatmul.mubr.msk.f32.gmra.mxu1 %vm338_vm12, %v2992_v40 }
 0x754   :  { %2488 = vmatprep.mubr.msk.f32.mxu1 %vm338_vm12, %v2996_v44 }
 0x757   :  { %2489 = vmatmul.mubr.msk.f32.gmra.mxu1 %vm338_vm12, %v2992_v40 }
 0x80b   :  { %v2481_v0 = vpop.f32.mrf.mxu1 }
 0x80c   :  { %v958_v1 = vadd.f32 %v2481_v0, %v3068_v63 }
 0x80d   :  { %v952_v2 = vpop.f32.mrf.mxu1 }
 0x80e   :  { %v953_v4 = vadd.f32 %v952_v2, %v3070_v25  ;;  %v995_v5 = vsel %vm991_vm0, %v958_v1, -inf }
 0x80f   :  { %996 = vmax.xlane.f32.xlu1 %v995_v5  ;;  %v2484_v6 = vpop.f32.mrf.mxu1 }
 0x810   :  { %v3078_v8 = vadd.f32 %v2484_v6, %v3073_v3  ;;  %v992_v13 = vsel %vm991_vm0, %v953_v4, -inf }
 0x811   :  { %v962_v7 = vpop.f32.mrf.mxu1  ;;  %993 = vmax.xlane.f32.xlu0 %v992_v13 }
 0x812   :  { %v963_v11 = vadd.f32 %v962_v7, %v3081_v9  ;;  %v1001_v12 = vsel %vm991_vm0, %v3078_v8, -inf }
 0x813   :  { %v2487_v10 = vpop.f32.mrf.mxu1 }
 0x814   :  { %v978_v18 = vadd.f32 %v2487_v10, %v3086_v14  ;;  %v998_v19 = vsel %vm991_vm0, %v963_v11, -inf }
 0x815   :  { %v972_v16 = vpop.f32.mrf.mxu1  ;;  %1002 = vmax.xlane.f32.xlu0 %v1001_v12 }
 0x816   :  { %v1007_v26 = vsel %vm991_vm0, %v978_v18, -inf  ;;  %v3113_v45 = vadd.f32 %v972_v16, %v3110_v43 }
 0x817   :  { %v2490_v21 = vpop.f32.mrf.mxu1 }
 0x818   :  { %v988_v24 = vadd.f32 %v2490_v21, %v3090_v20  ;;  %v1004_v22 = vsel %vm991_vm0, %v3113_v45, -inf }
 0x819   :  { %999 = vmax.xlane.f32.xlu0 %v998_v19  ;;  %v982_v15 = vpop.f32.mrf.mxu1 }
 0x81a   :  { %v1013_v30 = vsel %vm991_vm0, %v988_v24, -inf  ;;  %v3118_v50 = vadd.f32 %v982_v15, %v3115_v48 }
 0x81c   :  { %v1010_v29 = vsel %vm991_vm0, %v3118_v50, -inf }
 0x81d   :  { %1008 = vmax.xlane.f32.xlu0 %v1007_v26 }
 0x820   :  { %1102 = vrot.lane.b32.xlu1 %v839_v27, %s2803_s20 }
 0x821   :  { %1014 = vmax.xlane.f32.xlu0 %v1013_v30 }
 0x837   :  { %1100 = vrot.lane.b32.xlu0 %v838_v31, %s2803_s20 }
 0x83b   :  { %1094 = vrot.lane.b32.xlu0 %v835_v28, %s2803_s20 }
 0x844   :  { %1005 = vmax.xlane.f32.xlu1 %v1004_v22 }
 0x848   :  { %1011 = vmax.xlane.f32.xlu1 %v1010_v29 }
 0x859   :  { %1098 = vrot.lane.b32.xlu1 %v837_v55, %s2803_s20 }
 0x85d   :  { %1096 = vrot.lane.b32.xlu1 %v836_v56, %s2803_s20 }
 0x861   :  { %1092 = vrot.lane.b32.xlu1 %v834_v17, %s2803_s20 }
 0x898   :  { %v997_v61 = vpop.xlane.xlu1 %996 }
 0x899   :  { %v1017_v62 = vsub.f32 %v958_v1, %v997_v61 }
 0x89a   :  { %v994_v0 = vpop.xlane.xlu0 %993 }
 0x89b   :  { %v1026_v2 = vmul.f32 1.442695, %v1017_v62  ;;  %v1016_v5 = vsub.f32 %v953_v4, %v994_v0 }
 0x89c   :  { %v1103_v6 = vpop.permute.xlu1 %1102 }
 0x89d   :  { %2675 = vpow2.f32 %v1026_v2  ;;  %v1024_v13 = vmul.f32 1.442695, %v1016_v5  ;;  %2491 = vmatprep.subr.mxu0 %v1103_v6 }
 0x89e   :  { %2492 = vmatpush3.msra.mxu0 %v1103_v6  ;;  %v1003_v7 = vpop.xlane.xlu0 %1002 }
 0x89f   :  { %2677 = vpow2.f32 %v1024_v13  ;;  %v1019_v10 = vsub.f32 %v3078_v8, %v1003_v7  ;;  %v833_v13 = vmul.f32 %v3141_v59, %v2992_v40 }
 0x8a1   :  { %v1030_v12 = vmul.f32 1.442695, %v1019_v10 }
 0x8a2   :  { %v1000_v16 = vpop.xlane.xlu0 %999 }
 0x8a3   :  { %2679 = vpow2.f32 %v1030_v12  ;;  %v1018_v19 = vsub.f32 %v963_v11, %v1000_v16 }
 0x8a5   :  { %v1028_v21 = vmul.f32 1.442695, %v1018_v19 }
 0x8a6   :  { %v1009_v26 = vpop.xlane.xlu0 %1008 }
 0x8a7   :  { %2681 = vpow2.f32 %v1028_v21  ;;  %v1021_v1 = vsub.f32 %v978_v18, %v1009_v26 }
 0x8a9   :  { %v1034_v27 = vmul.f32 1.442695, %v1021_v1  ;;  %v832_v1 = vmul.f32 %v3139_v54, %v2996_v44 }
 0x8aa   :  { %v3144_v30 = vpop.eup %2675  ;;  %v1015_v4 = vpop.xlane.xlu0 %1014 }
 0x8ab   :  { %2683 = vpow2.f32 %v1034_v27  ;;  %v1023_v31 = vsub.f32 %v988_v24, %v1015_v4  ;;  %v1043_v28 = vsel %vm991_vm0, %v3144_v30, 0.0 }
 0x8ac   :  { %v2678_v15 = vpop.eup %2677  ;;  %1044 = vadd.xlane.f32.xlu1 %v1043_v28 }
 0x8ad   :  { %v1038_v8 = vmul.f32 1.442695, %v1023_v31  ;;  %v1040_v22 = vsel %vm991_vm0, %v2678_v15, 0.0 }
 0x8ae   :  { %1041 = vadd.xlane.f32.xlu0 %v1040_v22  ;;  %v1101_v11 = vpop.permute.xlu0 %1100 }
 0x8af   :  { %2685 = vpow2.f32 %v1038_v8  ;;  %2493 = vmatprep.subr.mxu0 %v1101_v11 }
 0x8b0   :  { %v3149_v29 = vpop.eup %2679  ;;  %2494 = vmatpush3.msra.mxu0 %v1101_v11 }
 0x8b1   :  { %v1049_v18 = vsel %vm991_vm0, %v3149_v29, 0.0 }
 0x8b2   :  { %1050 = vadd.xlane.f32.xlu0 %v1049_v18  ;;  %v1095_v19 = vpop.permute.xlu0 %1094 }
 0x8b4   :  { %v3153_v24 = vpop.eup %2681 }
 0x8b5   :  { %v1046_v55 = vsel %vm991_vm0, %v3153_v24, 0.0 }
 0x8b6   :  { %1047 = vadd.xlane.f32.xlu0 %v1046_v55 }
 0x8b8   :  { %v3157_v56 = vpop.eup %2683 }
 0x8b9   :  { %v1055_v17 = vsel %vm991_vm0, %v3157_v56, 0.0 }
 0x8ba   :  { %1056 = vadd.xlane.f32.xlu0 %v1055_v17 }
 0x8bc   :  { %v3161_v61 = vpop.eup %2685 }
 0x8bd   :  { %v1061_v62 = vsel %vm991_vm0, %v3161_v61, 0.0 }
 0x8be   :  { %1062 = vadd.xlane.f32.xlu0 %v1061_v62 }
 0x8cd   :  { %v1006_v0 = vpop.xlane.xlu1 %1005 }
 0x8ce   :  { %v1020_v2 = vsub.f32 %v3113_v45, %v1006_v0 }
 0x8d0   :  { %v1032_v5 = vmul.f32 1.442695, %v1020_v2 }
 0x8d1   :  { %v1012_v6 = vpop.xlane.xlu1 %1011 }
 0x8d2   :  { %2687 = vpow2.f32 %v1032_v5  ;;  %v1022_v7 = vsub.f32 %v3118_v50, %v1012_v6 }
 0x8d4   :  { %v1036_v10 = vmul.f32 1.442695, %v1022_v7  ;;  %1090 = vrot.lane.b32.xlu0 %v833_v13, %s2803_s20  ;;  %v678_v7 = vld [vmem:[#allocation2 + $0x192] sm:$0xff] }
 0x8d5   :  { %v1099_v12 = vpop.permute.xlu1 %1098 }
 0x8d6   :  { %2689 = vpow2.f32 %v1036_v10  ;;  %2495 = vmatprep.subr.mxu0 %v1099_v12  ;;  %v677_v10 = vld [vmem:[#allocation2 + $0x18a] sm:$0xff] }
 0x8d7   :  { %2496 = vmatpush3.msra.mxu0 %v1099_v12 }
 0x8d9   :  { %v1097_v16 = vpop.permute.xlu1 %1096 }
 0x8da   :  { %2497 = vmatprep.subr.mxu0 %v1097_v16 }
 0x8db   :  { %2498 = vmatpush3.msra.mxu0 %v1097_v16 }
 0x8dc   :  { %2499 = vmatprep.subr.mxu0 %v1095_v19 }
 0x8dd   :  { %v1093_v45 = vpop.permute.xlu1 %1092  ;;  %2500 = vmatpush3.msra.mxu0 %v1095_v19 }
 0x8de   :  { %2501 = vmatprep.subr.mxu0 %v1093_v45 }
 0x8df   :  { %v2688_v21 = vpop.eup %2687  ;;  %2502 = vmatpush3.msra.mxu0 %v1093_v45  ;;  %v676_v45 = vld [vmem:[#allocation2 + $0x182] sm:$0xff] }
 0x8e0   :  { %v1052_v40 = vsel %vm991_vm0, %v2688_v21, 0.0 }
 0x8e1   :  { %1053 = vadd.xlane.f32.xlu1 %v1052_v40 }
 0x8e3   :  { %v2690_v50 = vpop.eup %2689 }
 0x8e4   :  { %v1058_v26 = vsel %vm991_vm0, %v2690_v50, 0.0 }
 0x8e5   :  { %1059 = vadd.xlane.f32.xlu1 %v1058_v26 }
 0x8f6   :  { %1088 = vrot.lane.b32.xlu1 %v832_v1, %s2803_s20 }
 0x935   :  { %v1045_v55 = vpop.xlane.xlu1 %1044 }
 0x937   :  { %v1042_v27 = vpop.xlane.xlu0 %1041 }
 0x938   :  { %2691 = vrcp.f32 %v1042_v27 }
 0x939   :  { %2693 = vrcp.f32 %v1045_v55 }
 0x93b   :  { %v1051_v4 = vpop.xlane.xlu0 %1050 }
 0x93f   :  { %v1048_v31 = vpop.xlane.xlu0 %1047 }
 0x940   :  { %2695 = vrcp.f32 %v1048_v31 }
 0x941   :  { %2697 = vrcp.f32 %v1051_v4 }
 0x943   :  { %v1057_v28 = vpop.xlane.xlu0 %1056 }
 0x944   :  { %2699 = vrcp.f32 %v1057_v28 }
 0x945   :  { %v2692_v8 = vpop.eup %2691 }
 0x946   :  { %v1072_v22 = vmul.f32 %v2692_v8, %v2678_v15  ;;  %v2694_v62 = vpop.eup %2693  ;;  %v679_v15 = vld [vmem:[#allocation2 + $0x19a] sm:$0xff] }
 0x947   :  { %v1063_v11 = vpop.xlane.xlu0 %1062  ;;  %v1073_v5 = vmul.f32 %v2694_v62, %v3144_v30 }
 0x948   :  { %2507 = vmatprep.mubr.msk.f32.mxu0 %vm991_vm0, %v1072_v22 }
 0x94b   :  { %v1091_v18 = vpop.permute.xlu0 %1090 }
 0x94c   :  { %2503 = vmatprep.subr.mxu0 %v1091_v18 }
 0x94d   :  { %2504 = vmatpush3.msra.mxu0 %v1091_v18  ;;  %v2696_v0 = vpop.eup %2695 }
 0x94e   :  { %v2698_v6 = vpop.eup %2697  ;;  %v1074_v13 = vmul.f32 %v2696_v0, %v3153_v24 }
 0x94f   :  { %v1075_v16 = vmul.f32 %v2698_v6, %v3149_v29 }
 0x951   :  { %v2700_v12 = vpop.eup %2699 }
 0x952   :  { %v1077_v40 = vmul.f32 %v2700_v12, %v3157_v56 }
 0x96a   :  { %v1054_v44 = vpop.xlane.xlu1 %1053 }
 0x96b   :  { %2701 = vrcp.f32 %v1054_v44 }
 0x96c   :  { %2703 = vrcp.f32 %v1063_v11 }
 0x96e   :  { %v1060_v17 = vpop.xlane.xlu1 %1059 }
 0x96f   :  { %2705 = vrcp.f32 %v1060_v17 }
 0x972   :  { %v1089_v2 = vpop.permute.xlu1 %1088 }
 0x973   :  { %2505 = vmatprep.subr.mxu0 %v1089_v2 }
 0x974   :  { %2506 = vmatpush3.msra.mxu0 %v1089_v2  ;;  %v2219_v2 = vld [vmem:[#allocation2 + $0x1a2] ss:$0 sm:$0xff] }
 0x975   :  { %2508 = vmatmul.mubr.msk.f32.vlgmr.msra.gmra.mxu0 %vm991_vm0, %v1073_v5  ;;  %2519 = vmatprep.subr.mxu0 %v679_v15 }
 0x976   :  { %2510 = vmatprep.mubr.msk.f32.mxu0 %vm991_vm0, %v1074_v13  ;;  %2520 = vmatpush3.msra.mxu0 %v679_v15 }
 0x977   :  { %2521 = vmatprep.subr.mxu0 %v678_v7 }
 0x978   :  { %v2702_v19 = vpop.eup %2701  ;;  %2522 = vmatpush3.msra.mxu0 %v678_v7 }
 0x979   :  { %2511 = vmatmul.mubr.msk.f32.gmra.mxu0 %vm991_vm0, %v1075_v16  ;;  %v1076_v30 = vmul.f32 %v2702_v19, %v2688_v21  ;;  %2523 = vmatprep.subr.mxu0 %v677_v10  ;;  %v2704_v24 = vpop.eup %2703 }
 0x97a   :  { %2524 = vmatpush3.msra.mxu0 %v677_v10  ;;  %v1079_v1 = vmul.f32 %v2704_v24, %v3161_v61 }
 0x97b   :  { %2513 = vmatprep.mubr.msk.f32.mxu0 %vm991_vm0, %v1076_v30  ;;  %2525 = vmatprep.subr.mxu0 %v676_v45 }
 0x97c   :  { %v2706_v26 = vpop.eup %2705  ;;  %2526 = vmatpush3.msra.mxu0 %v676_v45 }
 0x97d   :  { %2514 = vmatmul.mubr.msk.f32.gmra.mxu0 %vm991_vm0, %v1077_v40  ;;  %v1078_v29 = vmul.f32 %v2706_v26, %v2690_v50 }
 0x97f   :  { %2516 = vmatprep.mubr.msk.f32.mxu0 %vm991_vm0, %v1078_v29 }
 0x981   :  { %2517 = vmatmul.mubr.msk.f32.gmra.mxu0 %vm991_vm0, %v1079_v1 }
 0xa35   :  { %v2509_v21 = vpop.f32.mrf.mxu0 }
 0xa37   :  { %v1202_v27 = vpop.f32.mrf.mxu0 }
 0xa38   :  { %2527 = vmatprep.mubr.msk.f32.mxu0 %vm338_vm12, %v1202_v27 }
 0xa39   :  { %v2512_v4 = vpop.f32.mrf.mxu0  ;;  %2528 = vmatmul.mubr.msk.f32.vlgmr.msra.gmra.mxu0 %vm338_vm12, %v2509_v21 }
 0xa3b   :  { %v1212_v56 = vpop.f32.mrf.mxu0 }
 0xa3c   :  { %2530 = vmatprep.mubr.msk.f32.mxu0 %vm338_vm12, %v1212_v56 }
 0xa3d   :  { %v2515_v31 = vpop.f32.mrf.mxu0  ;;  %2531 = vmatmul.mubr.msk.f32.gmra.mxu0 %vm338_vm12, %v2512_v4 }
 0xa3f   :  { %v1222_v50 = vpop.f32.mrf.mxu0 }
 0xa40   :  { %2533 = vmatprep.mubr.msk.f32.mxu0 %vm338_vm12, %v1222_v50  ;;  %v1424_v50 = vld [vmem:[#allocation2 + $0x1ad] sm:$0xff] }
 0xa41   :  { %v2518_v28 = vpop.f32.mrf.mxu0  ;;  %2534 = vmatmul.mubr.msk.f32.gmra.mxu0 %vm338_vm12, %v2515_v31  ;;  %v1426_v31 = vld [vmem:[#allocation2 + $0x1bd] sm:$0xff] }
 0xa42   :  { %2539 = vmatprep.subr.mxu1 %v1426_v31 }
 0xa43   :  { %v1232_v61 = vpop.f32.mrf.mxu0  ;;  %2540 = vmatpush3.msra.mxu1 %v1426_v31 }
 0xa44   :  { %2536 = vmatprep.mubr.msk.f32.mxu0 %vm338_vm12, %v1232_v61  ;;  %v2804_v61 = vmov 0.0  }
 0xa45   :  { %2537 = vmatmul.mubr.msk.f32.gmra.mxu0 %vm338_vm12, %v2518_v28  ;;  %v1423_v28 = vld [vmem:[#allocation2 + $0x1a5] sm:$0xff]  ;;  %2117 = vst [vmem:[#allocation5] sm:$0xff] %v2804_v61  ;;  %2118 = vst [vmem:[#allocation5 + $0x8] sm:$0xff] %v2804_v61 }
 0xaf9   :  { %v2529_v8 = vpop.f32.mrf.mxu0 }
 0xafb   :  { %v1331_v22 = vpop.f32.mrf.mxu0 }
 0xafd   :  { %v2532_v11 = vpop.f32.mrf.mxu0 }
 0xafe   :  { %v1371_v44 = vadd.f32 %v2532_v11, %v2529_v8 }
 0xaff   :  { %v1341_v18 = vpop.f32.mrf.mxu0 }
 0xb00   :  { %v1370_v62 = vadd.f32 %v1341_v18, %v1331_v22 }
 0xb01   :  { %v2535_v55 = vpop.f32.mrf.mxu0 }
 0xb02   :  { %v1373_v0 = vadd.f32 %v2535_v55, %v1371_v44 }
 0xb03   :  { %v1351_v17 = vpop.f32.mrf.mxu0 }
 0xb04   :  { %v1372_v5 = vadd.f32 %v1370_v62, %v1351_v17  ;;  %v2220_v62 = vld [vmem:[#allocation2 + $0x1a3] ss:$0 sm:$0xff] }
 0xb05   :  { %v2538_v15 = vpop.f32.mrf.mxu0 }
 0xb06   :  { %v1375_v6 = vadd.f32 %v2538_v15, %v1373_v0 }
 0xb07   :  { %v1361_v13 = vpop.f32.mrf.mxu0 }
 0xb08   :  { %v1381_v7 = vadd.f32 %v2219_v2, %v1375_v6  ;;  %v1374_v10 = vadd.f32 %v1372_v5, %v1361_v13 }
 0xb0a   :  { %v1380_v12 = vadd.f32 %v2219_v2, %v1374_v10  ;;  %v1383_v16 = vadd.f32 %v2976_v32, %v1381_v7  ;;  %v2221_v2 = vld [vmem:[#allocation2 + $0x1a4] ss:$0 sm:$0xff] }
 0xb0c   :  { %v1387_v19 = vsel %vm338_vm12, %v1383_v16, 0.0  ;;  %v1382_v45 = vadd.f32 %v1380_v12, %v2978_v35  ;;  %v1425_v35 = vld [vmem:[#allocation2 + $0x1b5] sm:$0xff]  ;;  %v2222_v12 = vld [vmem:[#allocation2 + $0x1c5] ss:$0 sm:$0xff] }
 0xb0d   :  { %1388 = vadd.xlane.f32.xlu1 %v1387_v19  ;;  %2541 = vmatprep.subr.mxu1 %v1425_v35 }
 0xb0e   :  { %v1384_v30 = vsel %vm338_vm12, %v1382_v45, 0.0  ;;  %2542 = vmatpush3.msra.mxu1 %v1425_v35 }
 0xb0f   :  { %1385 = vadd.xlane.f32.xlu0 %v1384_v30  ;;  %2543 = vmatprep.subr.mxu1 %v1424_v50 }
 0xb10   :  { %2544 = vmatpush3.msra.mxu1 %v1424_v50 }
 0xb11   :  { %2545 = vmatprep.subr.mxu1 %v1423_v28 }
 0xb12   :  { %2546 = vmatpush3.msra.mxu1 %v1423_v28 }
 0xb96   :  { %v1389_v24 = vpop.xlane.xlu1 %1388 }
 0xb97   :  { %v1392_v40 = vmul.f32 0.03125, %v1389_v24 }
 0xb98   :  { %v1386_v26 = vpop.xlane.xlu0 %1385 }
 0xb99   :  { %v1391_v29 = vmul.f32 0.03125, %v1386_v26  ;;  %v1394_v1 = vsub.f32 %v1383_v16, %v1392_v40 }
 0xb9b   :  { %v1393_v21 = vsub.f32 %v1382_v45, %v1391_v29  ;;  %v1396_v56 = vmul.f32 %v1394_v1, %v1394_v1 }
 0xb9d   :  { %v1395_v27 = vmul.f32 %v1393_v21, %v1393_v21  ;;  %v1400_v32 = vsel %vm338_vm12, %v1396_v56, 0.0 }
 0xb9f   :  { %v1397_v4 = vsel %vm338_vm12, %v1395_v27, 0.0 }
 0xba0   :  { %1398 = vadd.xlane.f32.xlu0 %v1397_v4 }
 0xba4   :  { %1401 = vadd.xlane.f32.xlu0 %v1400_v32 }
 0xc29   :  { %v1399_v8 = vpop.xlane.xlu0 %1398 }
 0xc2a   :  { %v1403_v22 = vmul.f32 0.03125, %v1399_v8 }
 0xc2c   :  { %v1405_v11 = vadd.f32 1e-05, %v1403_v22 }
 0xc2d   :  { %v1402_v18 = vpop.xlane.xlu0 %1401 }
 0xc2e   :  { %2707 = vrsqrt.f32 %v1405_v11  ;;  %v1404_v55 = vmul.f32 0.03125, %v1402_v18 }
 0xc30   :  { %v1406_v44 = vadd.f32 1e-05, %v1404_v55 }
 0xc32   :  { %2709 = vrsqrt.f32 %v1406_v44 }
 0xc3b   :  { %v2708_v17 = vpop.eup %2707 }
 0xc3c   :  { %v1409_v0 = vmul.f32 %v2708_v17, %v1393_v21 }
 0xc3e   :  { %v1415_v15 = vmul.f32 %v2220_v62, %v1409_v0 }
 0xc3f   :  { %v2710_v5 = vpop.eup %2709 }
 0xc40   :  { %v1410_v6 = vmul.f32 %v2710_v5, %v1394_v1  ;;  %v3202_v13 = vadd.f32 %v2221_v2, %v1415_v15 }
 0xc42   :  { %v1416_v7 = vmul.f32 %v2220_v62, %v1410_v6  ;;  %2547 = vmatprep.mubr.msk.f32.mxu1 %vm338_vm12, %v3202_v13  ;;  %2119 = vst.msk [vmem:[#allocation5] sm:$0xff] %vm338_vm12, %v3202_v13 }
 0xc44   :  { %v3208_v10 = vadd.f32 %v2221_v2, %v1416_v7 }
 0xc46   :  { %2548 = vmatmul.mubr.msk.f32.vlgmr.msra.gmra.mxu1 %vm338_vm12, %v3208_v10  ;;  %2120 = vst.msk [vmem:[#allocation5 + $0x8] sm:$0xff] %vm338_vm12, %v3208_v10 }
 0xd06   :  { %v2549_v16 = vpop.f32.mrf.mxu1 }
 0xd07   :  { %v3214_v19 = vadd.f32 %v2549_v16, %v2222_v12 }
 0xd08   :  { %v1511_v45 = vpop.f32.mrf.mxu1 }
 0xd09   :  { %v3216_v30 = vadd.f32 %v2222_v12, %v1511_v45  ;;  %v1527_v24 = vmul.f32 %v3214_v19, %v2984_v36  ;;  %v1525_v26 = vmul.f32 %v3214_v19, %v3000_v46  ;;  %v1523_v29 = vmul.f32 %v3214_v19, %v2990_v39 }
 0xd0b   :  { %1558 = vrot.lane.b32.xlu1 %v1527_v24, %s2802_s1  ;;  %2566 = vmatprep.mubr.msk.f32.mxu0 %vm338_vm12, %v3216_v30  ;;  %v1526_v40 = vmul.f32 %v3216_v30, %v2986_v37  ;;  %v1524_v36 = vmul.f32 %v3216_v30, %v2988_v38  ;;  %v1521_v37 = vmul.f32 %v3214_v19, %v3010_v49 }
 0xd0c   :  { %v1522_v46 = vmul.f32 %v3216_v30, %v2994_v42  ;;  %v1520_v39 = vmul.f32 %v3216_v30, %v3021_v51  ;;  %v1534_v15 = vmul.f32 %v3216_v30, %v3100_v33  ;;  %v1530_v33 = vmul.f32 %v3216_v30, %v3133_v57 }
 0xd0d   :  { %1556 = vrot.lane.b32.xlu0 %v1526_v40, %s2802_s1 }
 0xd0f   :  { %1554 = vrot.lane.b32.xlu1 %v1525_v26, %s2802_s1 }
 0xd11   :  { %1550 = vrot.lane.b32.xlu0 %v1523_v29, %s2802_s1 }
 0xd13   :  { %1552 = vrot.lane.b32.xlu1 %v1524_v36, %s2802_s1 }
 0xd15   :  { %1546 = vrot.lane.b32.xlu0 %v1521_v37, %s2802_s1 }
 0xd17   :  { %1548 = vrot.lane.b32.xlu1 %v1522_v46, %s2802_s1 }
 0xd1b   :  { %1544 = vrot.lane.b32.xlu1 %v1520_v39, %s2802_s1 }
 0xd7d   :  { %v1559_v1 = vpop.permute.xlu1 %1558 }
 0xd7e   :  { %2550 = vmatprep.subr.msk.mxu0 %vm338_vm12, %v1559_v1 }
 0xd7f   :  { %2551 = vmatpush3.xpose.msk.msra.mxu0 %vm338_vm12, %v1559_v1  ;;  %v1557_v38 = vpop.permute.xlu0 %1556 }
 0xd80   :  { %2552 = vmatprep.subr.msk.mxu0 %vm338_vm12, %v1557_v38 }
 0xd81   :  { %v1555_v49 = vpop.permute.xlu1 %1554 }
 0xd83   :  { %2553 = vmatpush3.xpose.msk.msra.mxu0 %vm338_vm12, %v1557_v38  ;;  %v1551_v51 = vpop.permute.xlu0 %1550 }
 0xd84   :  { %2554 = vmatprep.subr.msk.mxu0 %vm338_vm12, %v1555_v49 }
 0xd85   :  { %v1553_v42 = vpop.permute.xlu1 %1552 }
 0xd87   :  { %2555 = vmatpush3.xpose.msk.msra.mxu0 %vm338_vm12, %v1555_v49  ;;  %v1547_v27 = vpop.permute.xlu0 %1546 }
 0xd88   :  { %2556 = vmatprep.subr.msk.mxu0 %vm338_vm12, %v1553_v42 }
 0xd89   :  { %v1549_v21 = vpop.permute.xlu1 %1548 }
 0xd8b   :  { %2557 = vmatpush3.xpose.msk.msra.mxu0 %vm338_vm12, %v1553_v42 }
 0xd8c   :  { %2558 = vmatprep.subr.msk.mxu0 %vm338_vm12, %v1551_v51 }
 0xd8d   :  { %v1545_v4 = vpop.permute.xlu1 %1544 }
 0xd8f   :  { %2559 = vmatpush3.xpose.msk.msra.mxu0 %vm338_vm12, %v1551_v51 }
 0xd90   :  { %2560 = vmatprep.subr.msk.mxu0 %vm338_vm12, %v1549_v21 }
 0xd93   :  { %2561 = vmatpush3.xpose.msk.msra.mxu0 %vm338_vm12, %v1549_v21 }
 0xd94   :  { %2562 = vmatprep.subr.msk.mxu0 %vm338_vm12, %v1547_v27 }
 0xd97   :  { %2563 = vmatpush3.xpose.msk.msra.mxu0 %vm338_vm12, %v1547_v27 }
 0xd98   :  { %2564 = vmatprep.subr.msk.mxu0 %vm338_vm12, %v1545_v4 }
 0xd9b   :  { %2565 = vmatpush3.xpose.msk.msra.mxu0 %vm338_vm12, %v1545_v4 }
 0xd9e   :  { %2567 = vmatmul.mubr.msk.f32.vlgmr.msra.gmra.mxu0 %vm338_vm12, %v3214_v19 }
 0xd9f   :  { %2569 = vmatprep.mubr.msk.f32.mxu0 %vm338_vm12, %v3216_v30 }
 0xda2   :  { %2570 = vmatmul.mubr.msk.f32.gmra.mxu0 %vm338_vm12, %v3214_v19 }
 0xda3   :  { %2572 = vmatprep.mubr.msk.f32.mxu0 %vm338_vm12, %v3216_v30 }
 0xda6   :  { %2573 = vmatmul.mubr.msk.f32.gmra.mxu0 %vm338_vm12, %v3214_v19 }
 0xda7   :  { %2575 = vmatprep.mubr.msk.f32.mxu0 %vm338_vm12, %v3216_v30 }
 0xdaa   :  { %2576 = vmatmul.mubr.msk.f32.gmra.mxu0 %vm338_vm12, %v3214_v19 }
 0xe5e   :  { %v2568_v56 = vpop.f32.mrf.mxu0 }
 0xe5f   :  { %v1654_v32 = vadd.f32 %v2568_v56, %v3068_v63 }
 0xe60   :  { %v1648_v31 = vpop.f32.mrf.mxu0 }
 0xe61   :  { %v1649_v35 = vadd.f32 %v1648_v31, %v3070_v25  ;;  %v1690_v50 = vsel %vm991_vm0, %v1654_v32, -inf }
 0xe62   :  { %1691 = vmax.xlane.f32.xlu1 %v1690_v50  ;;  %v2571_v28 = vpop.f32.mrf.mxu0 }
 0xe63   :  { %v1687_v61 = vsel %vm991_vm0, %v1649_v35, -inf  ;;  %v1664_v18 = vadd.f32 %v2571_v28, %v3073_v3 }
 0xe64   :  { %v1658_v8 = vpop.f32.mrf.mxu0  ;;  %1688 = vmax.xlane.f32.xlu0 %v1687_v61 }
 0xe65   :  { %v1659_v22 = vadd.f32 %v1658_v8, %v3081_v9  ;;  %v1696_v62 = vsel %vm991_vm0, %v1664_v18, -inf }
 0xe66   :  { %v2574_v11 = vpop.f32.mrf.mxu0 }
 0xe67   :  { %v1693_v55 = vsel %vm991_vm0, %v1659_v22, -inf  ;;  %v1674_v25 = vadd.f32 %v2574_v11, %v3086_v14  ;;  %v1533_v14 = vmul.f32 %v3214_v19, %v3124_v52  ;;  %v1532_v52 = vmul.f32 %v3216_v30, %v3126_v53 }
 0xe68   :  { %v1668_v44 = vpop.f32.mrf.mxu0  ;;  %1694 = vmax.xlane.f32.xlu0 %v1693_v55 }
 0xe69   :  { %v1669_v63 = vadd.f32 %v1668_v44, %v3110_v43  ;;  %v1702_v2 = vsel %vm991_vm0, %v1674_v25, -inf  ;;  %v1535_v43 = vmul.f32 %v3214_v19, %v3092_v23 }
 0xe6a   :  { %v2577_v0 = vpop.f32.mrf.mxu0 }
 0xe6b   :  { %v1699_v17 = vsel %vm991_vm0, %v1669_v63, -inf  ;;  %v1684_v9 = vadd.f32 %v2577_v0, %v3090_v20  ;;  %v1531_v20 = vmul.f32 %v3214_v19, %v3104_v41 }
 0xe6c   :  { %1700 = vmax.xlane.f32.xlu1 %v1699_v17  ;;  %1697 = vmax.xlane.f32.xlu0 %v1696_v62  ;;  %v1678_v5 = vpop.f32.mrf.mxu0 }
 0xe6d   :  { %v1708_v3 = vsel %vm991_vm0, %v1684_v9, -inf  ;;  %v3301_v23 = vadd.f32 %v1678_v5, %v3115_v48 }
 0xe6f   :  { %v1705_v6 = vsel %vm991_vm0, %v3301_v23, -inf }
 0xe70   :  { %1703 = vmax.xlane.f32.xlu0 %v1702_v2 }
 0xe74   :  { %1709 = vmax.xlane.f32.xlu0 %v1708_v3 }
 0xe7d   :  { %1797 = vrot.lane.b32.xlu1 %v1535_v43, %s2803_s20 }
 0xe81   :  { %1793 = vrot.lane.b32.xlu1 %v1533_v14, %s2803_s20 }
 0xe8a   :  { %1795 = vrot.lane.b32.xlu0 %v1534_v15, %s2803_s20 }
 0xe8e   :  { %1789 = vrot.lane.b32.xlu0 %v1531_v20, %s2803_s20 }
 0xea5   :  { %1706 = vmax.xlane.f32.xlu1 %v1705_v6 }
 0xeb6   :  { %1791 = vrot.lane.b32.xlu1 %v1532_v52, %s2803_s20 }
 0xeba   :  { %1787 = vrot.lane.b32.xlu1 %v1530_v33, %s2803_s20 }
 0xeeb   :  { %v1692_v41 = vpop.xlane.xlu1 %1691 }
 0xeec   :  { %v1712_v7 = vsub.f32 %v1654_v32, %v1692_v41 }
 0xeed   :  { %v1689_v12 = vpop.xlane.xlu0 %1688 }
 0xeee   :  { %v1721_v16 = vmul.f32 1.442695, %v1712_v7  ;;  %v1711_v48 = vsub.f32 %v1649_v35, %v1689_v12 }
 0xef0   :  { %2711 = vpow2.f32 %v1721_v16  ;;  %v1719_v45 = vmul.f32 1.442695, %v1711_v48  ;;  %v1431_v48 = vld [vmem:[#allocation2 + $0x1de] sm:$0xff] }
 0xef1   :  { %v1695_v24 = vpop.xlane.xlu0 %1694 }
 0xef2   :  { %2713 = vpow2.f32 %v1719_v45  ;;  %v1713_v40 = vsub.f32 %v1659_v22, %v1695_v24 }
 0xef4   :  { %v1723_v26 = vmul.f32 1.442695, %v1713_v40 }
 0xef5   :  { %v1701_v29 = vpop.xlane.xlu1 %1700  ;;  %v1698_v53 = vpop.xlane.xlu0 %1697 }
 0xef6   :  { %2715 = vpow2.f32 %v1723_v26  ;;  %v1715_v36 = vsub.f32 %v1669_v63, %v1701_v29  ;;  %v1714_v37 = vsub.f32 %v1664_v18, %v1698_v53  ;;  %v1430_v26 = vld [vmem:[#allocation2 + $0x1d6] sm:$0xff]  ;;  %v1429_v53 = vld [vmem:[#allocation2 + $0x1ce] sm:$0xff] }
 0xef8   :  { %v1727_v46 = vmul.f32 1.442695, %v1715_v36  ;;  %v1725_v57 = vmul.f32 1.442695, %v1714_v37 }
 0xef9   :  { %v1798_v39 = vpop.permute.xlu1 %1797  ;;  %v1704_v1 = vpop.xlane.xlu0 %1703 }
 0xefa   :  { %2717 = vpow2.f32 %v1727_v46  ;;  %v1716_v38 = vsub.f32 %v1674_v25, %v1704_v1  ;;  %2578 = vmatprep.subr.mxu1 %v1798_v39  ;;  %v1529_v25 = vmul.f32 %v3214_v19, %v3141_v59  ;;  %v1528_v59 = vmul.f32 %v3216_v30, %v3139_v54 }
 0xefb   :  { %2719 = vpow2.f32 %v1725_v57  ;;  %2579 = vmatpush3.msra.mxu1 %v1798_v39  ;;  %v1428_v57 = vld [vmem:[#allocation2 + $0x1c6] sm:$0xff] }
 0xefc   :  { %v1729_v49 = vmul.f32 1.442695, %v1716_v38 }
 0xefd   :  { %v3311_v42 = vpop.eup %2711  ;;  %v1710_v51 = vpop.xlane.xlu0 %1709 }
 0xefe   :  { %2721 = vpow2.f32 %v1729_v49  ;;  %v1718_v21 = vsub.f32 %v1684_v9, %v1710_v51  ;;  %v1738_v27 = vsel %vm991_vm0, %v3311_v42, 0.0  ;;  %v1794_v50 = vpop.permute.xlu1 %1793 }
 0xeff   :  { %v2714_v4 = vpop.eup %2713  ;;  %1739 = vadd.xlane.f32.xlu0 %v1738_v27 }
 0xf00   :  { %v1733_v56 = vmul.f32 1.442695, %v1718_v21  ;;  %v1735_v32 = vsel %vm991_vm0, %v2714_v4, 0.0 }
 0xf01   :  { %1736 = vadd.xlane.f32.xlu1 %v1735_v32  ;;  %v1796_v31 = vpop.permute.xlu0 %1795 }
 0xf02   :  { %2723 = vpow2.f32 %v1733_v56  ;;  %2580 = vmatprep.subr.mxu1 %v1796_v31 }
 0xf03   :  { %v3316_v35 = vpop.eup %2715  ;;  %2581 = vmatpush3.msra.mxu1 %v1796_v31 }
 0xf04   :  { %2582 = vmatprep.subr.mxu1 %v1794_v50  ;;  %v1741_v28 = vsel %vm991_vm0, %v3316_v35, 0.0 }
 0xf05   :  { %1742 = vadd.xlane.f32.xlu1 %v1741_v28  ;;  %2583 = vmatpush3.msra.mxu1 %v1794_v50  ;;  %v1790_v2 = vpop.permute.xlu0 %1789 }
 0xf07   :  { %v3320_v61 = vpop.eup %2717 }
 0xf08   :  { %v3322_v8 = vpop.eup %2719  ;;  %v1747_v22 = vsel %vm991_vm0, %v3320_v61, 0.0 }
 0xf09   :  { %1748 = vadd.xlane.f32.xlu1 %v1747_v22  ;;  %v1744_v11 = vsel %vm991_vm0, %v3322_v8, 0.0 }
 0xf0a   :  { %1745 = vadd.xlane.f32.xlu0 %v1744_v11 }
 0xf0b   :  { %v3328_v18 = vpop.eup %2721 }
 0xf0c   :  { %v1750_v55 = vsel %vm991_vm0, %v3328_v18, 0.0 }
 0xf0e   :  { %1751 = vadd.xlane.f32.xlu0 %v1750_v55 }
 0xf0f   :  { %v3332_v44 = vpop.eup %2723 }
 0xf10   :  { %v1756_v63 = vsel %vm991_vm0, %v3332_v44, 0.0 }
 0xf12   :  { %1757 = vadd.xlane.f32.xlu0 %v1756_v63  ;;  %v2257_v63 = vld [vmem:[#allocation2 + $0x1e6] ss:$0 sm:$0xff] }
 0xf28   :  { %1785 = vrot.lane.b32.xlu0 %v1529_v25, %s2803_s20 }
 0xf2e   :  { %v1707_v17 = vpop.xlane.xlu1 %1706 }
 0xf2f   :  { %v1717_v62 = vsub.f32 %v3301_v23, %v1707_v17 }
 0xf31   :  { %v1731_v0 = vmul.f32 1.442695, %v1717_v62 }
 0xf32   :  { %v1792_v9 = vpop.permute.xlu1 %1791 }
 0xf33   :  { %2725 = vpow2.f32 %v1731_v0  ;;  %2584 = vmatprep.subr.mxu1 %v1792_v9 }
 0xf34   :  { %2585 = vmatpush3.msra.mxu1 %v1792_v9 }
 0xf35   :  { %2586 = vmatprep.subr.mxu1 %v1790_v2 }
 0xf36   :  { %v1788_v3 = vpop.permute.xlu1 %1787  ;;  %2587 = vmatpush3.msra.mxu1 %v1790_v2 }
 0xf37   :  { %2588 = vmatprep.subr.mxu1 %v1788_v3 }
 0xf38   :  { %2589 = vmatpush3.msra.mxu1 %v1788_v3 }
 0xf40   :  { %v2726_v43 = vpop.eup %2725 }
 0xf41   :  { %v1753_v14 = vsel %vm991_vm0, %v2726_v43, 0.0 }
 0xf42   :  { %1754 = vadd.xlane.f32.xlu1 %v1753_v14 }
 0xf53   :  { %1783 = vrot.lane.b32.xlu1 %v1528_v59, %s2803_s20 }
 0xf88   :  { %v1740_v15 = vpop.xlane.xlu0 %1739 }
 0xf8a   :  { %v1737_v19 = vpop.xlane.xlu1 %1736 }
 0xf8b   :  { %2727 = vrcp.f32 %v1737_v19 }
 0xf8c   :  { %2729 = vrcp.f32 %v1740_v15 }
 0xf8e   :  { %v1743_v41 = vpop.xlane.xlu1 %1742 }
 0xf8f   :  { %2731 = vrcp.f32 %v1743_v41 }
 0xf92   :  { %v1749_v7 = vpop.xlane.xlu1 %1748 }
 0xf93   :  { %v1746_v20 = vpop.xlane.xlu0 %1745 }
 0xf94   :  { %2733 = vrcp.f32 %v1746_v20 }
 0xf95   :  { %2735 = vrcp.f32 %v1749_v7 }
 0xf97   :  { %v1752_v5 = vpop.xlane.xlu0 %1751 }
 0xf98   :  { %v2728_v23 = vpop.eup %2727  ;;  %2737 = vrcp.f32 %v1752_v5 }
 0xf99   :  { %v1767_v6 = vmul.f32 %v2728_v23, %v2714_v4  ;;  %v2730_v30 = vpop.eup %2729 }
 0xf9a   :  { %v1768_v45 = vmul.f32 %v2730_v30, %v3311_v42 }
 0xf9b   :  { %v1758_v52 = vpop.xlane.xlu0 %1757  ;;  %2594 = vmatprep.mubr.msk.f32.mxu1 %vm991_vm0, %v1767_v6 }
 0xf9c   :  { %2739 = vrcp.f32 %v1758_v52  ;;  %v2732_v12 = vpop.eup %2731 }
 0xf9d   :  { %v1769_v40 = vmul.f32 %v2732_v12, %v3316_v35 }
 0xf9f   :  { %v1786_v33 = vpop.permute.xlu0 %1785 }
 0xfa0   :  { %2590 = vmatprep.subr.mxu1 %v1786_v33 }
 0xfa1   :  { %2591 = vmatpush3.msra.mxu1 %v1786_v33  ;;  %v2734_v24 = vpop.eup %2733 }
 0xfa2   :  { %v2736_v29 = vpop.eup %2735  ;;  %v1770_v36 = vmul.f32 %v2734_v24, %v3322_v8  ;;  %v2259_v24 = vld [vmem:[#allocation2 + $0x1e8] ss:$0 sm:$0xff] }
 0xfa3   :  { %v1771_v46 = vmul.f32 %v2736_v29, %v3320_v61 }
 0xfa5   :  { %v2738_v37 = vpop.eup %2737 }
 0xfa6   :  { %v1772_v1 = vmul.f32 %v2738_v37, %v3328_v18 }
 0xfa9   :  { %v2740_v39 = vpop.eup %2739 }
 0xfaa   :  { %v1774_v42 = vmul.f32 %v2740_v39, %v3332_v44 }
 0xfcb   :  { %v1755_v54 = vpop.xlane.xlu1 %1754 }
 0xfcc   :  { %2741 = vrcp.f32 %v1755_v54 }
 0xfcf   :  { %v1784_v16 = vpop.permute.xlu1 %1783 }
 0xfd0   :  { %2592 = vmatprep.subr.mxu1 %v1784_v16 }
 0xfd1   :  { %2593 = vmatpush3.msra.mxu1 %v1784_v16 }
 0xfd2   :  { %2595 = vmatmul.mubr.msk.f32.vlgmr.msra.gmra.mxu1 %vm991_vm0, %v1768_v45  ;;  %2606 = vmatprep.subr.mxu1 %v1431_v48 }
 0xfd3   :  { %2597 = vmatprep.mubr.msk.f32.mxu1 %vm991_vm0, %v1769_v40  ;;  %2607 = vmatpush3.msra.mxu1 %v1431_v48  ;;  %v2258_v48 = vld [vmem:[#allocation2 + $0x1e7] ss:$0 sm:$0xff] }
 0xfd4   :  { %2608 = vmatprep.subr.mxu1 %v1430_v26 }
 0xfd5   :  { %2609 = vmatpush3.msra.mxu1 %v1430_v26 }
 0xfd6   :  { %2598 = vmatmul.mubr.msk.f32.gmra.mxu1 %vm991_vm0, %v1770_v36  ;;  %2610 = vmatprep.subr.mxu1 %v1429_v53 }
 0xfd7   :  { %2600 = vmatprep.mubr.msk.f32.mxu1 %vm991_vm0, %v1771_v46  ;;  %2611 = vmatpush3.msra.mxu1 %v1429_v53 }
 0xfd8   :  { %2612 = vmatprep.subr.mxu1 %v1428_v57 }
 0xfd9   :  { %v2742_v38 = vpop.eup %2741  ;;  %2613 = vmatpush3.msra.mxu1 %v1428_v57 }
 0xfda   :  { %2601 = vmatmul.mubr.msk.f32.gmra.mxu1 %vm991_vm0, %v1772_v1  ;;  %v1773_v49 = vmul.f32 %v2742_v38, %v2726_v43 }
 0xfdc   :  { %2603 = vmatprep.mubr.msk.f32.mxu1 %vm991_vm0, %v1773_v49 }
 0xfde   :  { %2604 = vmatmul.mubr.msk.f32.gmra.mxu1 %vm991_vm0, %v1774_v42 }
0x1092   :  { %v2596_v51 = vpop.f32.mrf.mxu1 }
0x1094   :  { %v1897_v21 = vpop.f32.mrf.mxu1 }
0x1095   :  { %2614 = vmatprep.mubr.msk.f32.mxu1 %vm338_vm12, %v1897_v21 }
0x1096   :  { %v2599_v27 = vpop.f32.mrf.mxu1  ;;  %2615 = vmatmul.mubr.msk.f32.vlgmr.msra.gmra.mxu1 %vm338_vm12, %v2596_v51 }
0x1098   :  { %v1907_v4 = vpop.f32.mrf.mxu1 }
0x1099   :  { %2617 = vmatprep.mubr.msk.f32.mxu1 %vm338_vm12, %v1907_v4 }
0x109a   :  { %v2602_v56 = vpop.f32.mrf.mxu1  ;;  %2618 = vmatmul.mubr.msk.f32.gmra.mxu1 %vm338_vm12, %v2599_v27 }
0x109c   :  { %v1917_v32 = vpop.f32.mrf.mxu1 }
0x109d   :  { %2620 = vmatprep.mubr.msk.f32.mxu1 %vm338_vm12, %v1917_v32 }
0x109e   :  { %v2605_v31 = vpop.f32.mrf.mxu1  ;;  %2621 = vmatmul.mubr.msk.f32.gmra.mxu1 %vm338_vm12, %v2602_v56 }
0x10a0   :  { %v1927_v35 = vpop.f32.mrf.mxu1 }
0x10a1   :  { %2623 = vmatprep.mubr.msk.f32.mxu1 %vm338_vm12, %v1927_v35 }
0x10a2   :  { %2624 = vmatmul.mubr.msk.f32.gmra.mxu1 %vm338_vm12, %v2605_v31 }
0x1156   :  { %v2616_v50 = vpop.f32.mrf.mxu1 }
0x1158   :  { %v2026_v28 = vpop.f32.mrf.mxu1 }
0x115a   :  { %v2619_v61 = vpop.f32.mrf.mxu1 }
0x115b   :  { %v2066_v11 = vadd.f32 %v2619_v61, %v2616_v50 }
0x115c   :  { %v2036_v8 = vpop.f32.mrf.mxu1 }
0x115d   :  { %v2065_v55 = vadd.f32 %v2036_v8, %v2026_v28 }
0x115e   :  { %v2622_v22 = vpop.f32.mrf.mxu1 }
0x115f   :  { %v2068_v44 = vadd.f32 %v2622_v22, %v2066_v11 }
0x1160   :  { %v2046_v18 = vpop.f32.mrf.mxu1 }
0x1161   :  { %v2067_v17 = vadd.f32 %v2065_v55, %v2046_v18 }
0x1162   :  { %v2625_v25 = vpop.f32.mrf.mxu1 }
0x1163   :  { %v2070_v62 = vadd.f32 %v2625_v25, %v2068_v44 }
0x1164   :  { %v2056_v0 = vpop.f32.mrf.mxu1 }
0x1165   :  { %v2076_v9 = vadd.f32 %v2257_v63, %v2070_v62  ;;  %v2069_v2 = vadd.f32 %v2067_v17, %v2056_v0 }
0x1167   :  { %v2075_v3 = vadd.f32 %v2257_v63, %v2069_v2  ;;  %v2078_v43 = vadd.f32 %v2076_v9, %v3208_v10 }
0x1169   :  { %v2082_v14 = vsel %vm338_vm12, %v2078_v43, 0.0  ;;  %v2077_v59 = vadd.f32 %v2075_v3, %v3202_v13 }
0x116a   :  { %2083 = vadd.xlane.f32.xlu1 %v2082_v14 }
0x116b   :  { %v2079_v19 = vsel %vm338_vm12, %v2077_v59, 0.0 }
0x116c   :  { %2080 = vadd.xlane.f32.xlu0 %v2079_v19 }
0x117b   :  { %2134 = vrot.lane.b32.xlu1 %v2958_v60, %s2803_s20 }
0x117f   :  { %2136 = vrot.lane.b32.xlu1 %v2954_v58, %s2803_s20 }
0x11f3   :  { %v2084_v15 = vpop.xlane.xlu1 %2083 }
0x11f4   :  { %v2086_v20 = vmul.f32 0.03125, %v2084_v15 }
0x11f5   :  { %v2081_v5 = vpop.xlane.xlu0 %2080 }
0x11f6   :  { %v2085_v23 = vmul.f32 0.03125, %v2081_v5  ;;  %v2088_v6 = vsub.f32 %v2078_v43, %v2086_v20 }
0x11f7   :  { %v2135_v46 = vpop.permute.xlu1 %2134 }
0x11f8   :  { %v2087_v10 = vsub.f32 %v2077_v59, %v2085_v23  ;;  %v2090_v13 = vmul.f32 %v2088_v6, %v2088_v6 }
0x11fa   :  { %v2089_v52 = vmul.f32 %v2087_v10, %v2087_v10  ;;  %v2094_v41 = vsel %vm338_vm12, %v2090_v13, 0.0 }
0x11fb   :  { %v2137_v57 = vpop.permute.xlu1 %2136 }
0x11fc   :  { %v2091_v33 = vsel %vm338_vm12, %v2089_v52, 0.0 }
0x11fd   :  { %2092 = vadd.xlane.f32.xlu0 %v2091_v33 }
0x1201   :  { %2095 = vadd.xlane.f32.xlu0 %v2094_v41 }
0x1286   :  { %v2093_v7 = vpop.xlane.xlu0 %2092 }
0x1287   :  { %v2097_v54 = vmul.f32 0.03125, %v2093_v7 }
0x1289   :  { %v2099_v60 = vadd.f32 1e-05, %v2097_v54 }
0x128a   :  { %v2096_v30 = vpop.xlane.xlu0 %2095 }
0x128b   :  { %2743 = vrsqrt.f32 %v2099_v60  ;;  %v2098_v58 = vmul.f32 0.03125, %v2096_v30 }
0x128d   :  { %v2100_v12 = vadd.f32 1e-05, %v2098_v58 }
0x128f   :  { %2745 = vrsqrt.f32 %v2100_v12 }
0x1298   :  { %v2744_v16 = vpop.eup %2743 }
0x1299   :  { %v2103_v45 = vmul.f32 %v2744_v16, %v2087_v10 }
0x129b   :  { %v2109_v40 = vmul.f32 %v2258_v48, %v2103_v45 }
0x129c   :  { %v2746_v26 = vpop.eup %2745 }
0x129d   :  { %v2115_v29 = vadd.f32 %v2259_v24, %v2109_v40  ;;  %v2104_v53 = vmul.f32 %v2746_v26, %v2088_v6 }
0x129f   :  { %2123 = vrot.lane.b32.xlu1 %v2115_v29, %s2801_s0  ;;  %v2110_v36 = vmul.f32 %v2258_v48, %v2104_v53 }
0x12a1   :  { %v2116_v37 = vadd.f32 %v2259_v24, %v2110_v36 }
0x12a3   :  { %2148 = vrot.lane.b32.xlu1 %v2950_v47, %s2805_s21  ;;  %2125 = vrot.lane.b32.xlu0 %v2116_v37, %s2801_s0 }
0x12a7   :  { %2143 = vrot.lane.b32.xlu0 %v2945_v34, %s2805_s21 }
0x1311   :  { %v2124_v39 = vpop.permute.xlu1 %2123 }
0x1312   :  { %2130 = vst.msk [vmem:[#allocation5] sm:$0xff] %vm2129_vm2, %v2124_v39 }
0x1313   :  { %2141 = vst.msk [vmem:[#allocation5] sm:$0xff] %vm2140_vm3, %v2135_v46 }
0x1315   :  { %v2149_v1 = vpop.permute.xlu1 %2148  ;;  %v2126_v38 = vpop.permute.xlu0 %2125 }
0x1316   :  { %2151 = vst.msk [vmem:[#allocation5 + $0x1] sm:$0x1] %vm2146_vm4, %v2149_v1 }
0x1317   :  { %2131 = vst.msk [vmem:[#allocation5 + $0x8] sm:$0xff] %vm2129_vm2, %v2126_v38 }
0x1318   :  { %2142 = vst.msk [vmem:[#allocation5 + $0x8] sm:$0xff] %vm2140_vm3, %v2137_v57 }
0x1319   :  { %v2144_v47 = vpop.permute.xlu0 %2143 }
0x131a   :  { %2147 = vst.msk [vmem:[#allocation5] sm:$0x1] %vm2146_vm4, %v2144_v47 }
0x131b   :  { %2778 = shalt.err (!%p2775_p9)
}
0x131c   :  { %2163 = dma.vmem_to_hbm [thread:$0]  %s2158_s23, 256, %s3388_s2, [#allocation4], %s2792_s12, %s2792_s12, %s2793_s13  }
0x131d   :  { %2789 = dma.done.wait [#allocation4], 256  }
0x131e   :  { %2790 = vsyncadd [#allocation4], 4294967040 }
0x131f   :  { %2167 = vsyncpa [#allocation3], 1 }
0x1320   :  { %2168 = vsyncpa [#allocation4], 1 }

</bundles_post_ra>
